<compile_context>
chip_gen: v5e
topology: v5e:2x2
jax: 0.10.0
libtpu: 0.0.40
codegen_flags: <defaults>
</compile_context>

<pallas_src>
import math

import jax
import jax.numpy as jnp
from jax.experimental import pallas as pl
from jax.experimental.pallas import tpu as pltpu

IN_DIM = 3840
H1_DIM = 128
H2_DIM = 64
OUT_DIM = 6


def _round_up(x, m):
    return ((x + m - 1) // m) * m


def mlp_kernel(x_ref, w1_ref, b1_ref, w2_ref, b2_ref, w3_ref, b3_ref, o_ref):
    # Cast to bf16 for the MXU (native rate); accumulate in f32.
    x = x_ref[...].astype(jnp.bfloat16)
    w1 = w1_ref[...].astype(jnp.bfloat16)

    # fc1 + relu   (dominant matmul: TB x 3840 x 128)
    h1 = jnp.dot(x, w1, preferred_element_type=jnp.float32)
    h1 = jnp.maximum(h1 + b1_ref[...], 0.0)

    # fc2 + relu   (TB x 128 x 64)
    h2 = jnp.dot(h1.astype(jnp.bfloat16), w2_ref[...].astype(jnp.bfloat16),
                 preferred_element_type=jnp.float32)
    h2 = jnp.maximum(h2 + b2_ref[...], 0.0)

    # fc3 + sigmoid  (TB x 64 x 6)
    logits = jnp.dot(h2.astype(jnp.bfloat16), w3_ref[...].astype(jnp.bfloat16),
                     preferred_element_type=jnp.float32)
    o_ref[...] = jax.nn.sigmoid(logits + b3_ref[...])


def simple_model_forward(x, params, *, block_b=512):
    """x: [B, 3840] float32 -> [B, 6] float32."""
    w1, b1, w2, b2, w3, b3 = params
    B = x.shape[0]

    # Batch tile: multiple of 8 (f32 sublane packing), capped so the
    # double-buffered f32 x tile fits comfortably even in v7x's 64 MiB VMEM
    # (2 * 512 * 3840 * 4B ~= 15 MiB for x, ~4 MiB of weights).
    TB = min(block_b, _round_up(B, 8))
    B_pad = _round_up(B, TB)
    if B_pad != B:
        x = jnp.pad(x, ((0, B_pad - B), (0, 0)))
    grid = (B_pad // TB,)

    flops = 2 * B_pad * (IN_DIM * H1_DIM + H1_DIM * H2_DIM + H2_DIM * OUT_DIM)
    bytes_accessed = (
        x.size * 4                                   # f32 activation stream
        + (w1.size + w2.size + w3.size) * 4          # weights (fetched once)
        + (b1.size + b2.size + b3.size) * 4
        + B_pad * OUT_DIM * 4                        # f32 output
    )
    cost = pl.CostEstimate(
        flops=flops,
        transcendentals=B_pad * OUT_DIM,  # sigmoid exp
        bytes_accessed=bytes_accessed,
    )

    out = pl.pallas_call(
        mlp_kernel,
        out_shape=jax.ShapeDtypeStruct((B_pad, OUT_DIM), jnp.float32),
        grid=grid,
        in_specs=[
            # x: streamed per batch tile (pipelined / double-buffered).
            pl.BlockSpec((TB, IN_DIM), lambda i: (i, 0)),
            # Weights & biases: constant index_map -> fetched once, resident.
            pl.BlockSpec((IN_DIM, H1_DIM), lambda i: (0, 0)),
            pl.BlockSpec((1, H1_DIM), lambda i: (0, 0)),
            pl.BlockSpec((H1_DIM, H2_DIM), lambda i: (0, 0)),
            pl.BlockSpec((1, H2_DIM), lambda i: (0, 0)),
            pl.BlockSpec((H2_DIM, OUT_DIM), lambda i: (0, 0)),
            pl.BlockSpec((1, OUT_DIM), lambda i: (0, 0)),
        ],
        out_specs=pl.BlockSpec((TB, OUT_DIM), lambda i: (i, 0)),
        compiler_params=pltpu.CompilerParams(
            dimension_semantics=("parallel",),  # megacore sharding on v7x
            vmem_limit_bytes=48 * 1024 * 1024,
        ),
        cost_estimate=cost,
    )(x, w1, b1, w2, b2, w3, b3)

    return out[:B]


def init_linear_params(key, in_features, out_features):
    """Deterministic init mimicking nn.Linear's uniform(-1/sqrt(fan_in), ...)."""
    k_w, k_b = jax.random.split(key)
    bound = 1.0 / math.sqrt(in_features)
    # Stored as [in, out] (transposed vs PyTorch) so the kernel computes x @ W.
    w = jax.random.uniform(
        k_w, (in_features, out_features), jnp.float32, -bound, bound
    )
    b = jax.random.uniform(k_b, (1, out_features), jnp.float32, -bound, bound)
    return w, b


def make_params(key):
    k1, k2, k3 = jax.random.split(key, 3)
    w1, b1 = init_linear_params(k1, IN_DIM, H1_DIM)
    w2, b2 = init_linear_params(k2, H1_DIM, H2_DIM)
    w3, b3 = init_linear_params(k3, H2_DIM, OUT_DIM)
    return (w1, b1, w2, b2, w3, b3)


if __name__ == "__main__":
    key = jax.random.PRNGKey(0)
    k_params, k_x = jax.random.split(key)

    params = make_params(k_params)
    B = 8
    x = jax.random.normal(k_x, (B, IN_DIM), jnp.float32)

    out = simple_model_forward(x, params)
    out = jax.block_until_ready(out)

    # Sanity check against a plain-JAX f32 reference (bf16 MXU => loose tol).
    w1, b1, w2, b2, w3, b3 = params
    ref = jnp.maximum(x @ w1 + b1, 0.0)
    ref = jnp.maximum(ref @ w2 + b2, 0.0)
    ref = jax.nn.sigmoid(ref @ w3 + b3)
    assert out.shape == (B, OUT_DIM)
    assert jnp.allclose(out, ref, atol=2e-2, rtol=2e-2), (
        float(jnp.max(jnp.abs(out - ref)))
    )

    print("KERNEL_OK")
</pallas_src>

<mosaic_0001>
module attributes {stable_mosaic.version = 11 : i64} {
  func.func @mlp_kernel(%arg0: i32, %arg1: memref<8x3840xf32, #tpu.memory_space<vmem>>, %arg2: memref<3840x128xf32, #tpu.memory_space<vmem>>, %arg3: memref<1x128xf32, #tpu.memory_space<vmem>>, %arg4: memref<128x64xf32, #tpu.memory_space<vmem>>, %arg5: memref<1x64xf32, #tpu.memory_space<vmem>>, %arg6: memref<64x6xf32, #tpu.memory_space<vmem>>, %arg7: memref<1x6xf32, #tpu.memory_space<vmem>>, %arg8: memref<8x6xf32, #tpu.memory_space<vmem>>) attributes {dimension_semantics = [#tpu.dimension_semantics<parallel>], iteration_bounds = array<i64: 1>, scalar_prefetch = 0 : i64, scratch_operands = 0 : i64, tpu.core_type = #tpu.core_type<tc>, window_params = [{transform_indices = @transform_0, window_bounds = array<i64: 8, 3840>}, {pipeline_mode = #tpu.pipeline_mode<synchronous>, transform_indices = @transform_1, window_bounds = array<i64: 3840, 128>}, {pipeline_mode = #tpu.pipeline_mode<synchronous>, transform_indices = @transform_2, window_bounds = array<i64: 1, 128>}, {pipeline_mode = #tpu.pipeline_mode<synchronous>, transform_indices = @transform_3, window_bounds = array<i64: 128, 64>}, {pipeline_mode = #tpu.pipeline_mode<synchronous>, transform_indices = @transform_4, window_bounds = array<i64: 1, 64>}, {pipeline_mode = #tpu.pipeline_mode<synchronous>, transform_indices = @transform_5, window_bounds = array<i64: 64, 6>}, {pipeline_mode = #tpu.pipeline_mode<synchronous>, transform_indices = @transform_6, window_bounds = array<i64: 1, 6>}, {transform_indices = @transform_7, window_bounds = array<i64: 8, 6>}]} {
    %c0 = arith.constant 0 : index
    %c0_0 = arith.constant 0 : index
    %0 = vector.load %arg1[%c0, %c0_0] : memref<8x3840xf32, #tpu.memory_space<vmem>>, vector<8x3840xf32>
    %1 = arith.truncf %0 : vector<8x3840xf32> to vector<8x3840xbf16>
    %c0_1 = arith.constant 0 : index
    %c0_2 = arith.constant 0 : index
    %2 = vector.load %arg2[%c0_1, %c0_2] : memref<3840x128xf32, #tpu.memory_space<vmem>>, vector<3840x128xf32>
    %3 = arith.truncf %2 : vector<3840x128xf32> to vector<3840x128xbf16>
    %cst = arith.constant dense<0.000000e+00> : vector<8x128xf32>
    %4 = tpu.matmul %1, %3, %cst {dimension_numbers = #tpu.dot_dimension_numbers<[1], [0], [0], [1], [0, 0, 1, 1], [], []>} : vector<8x3840xbf16>, vector<3840x128xbf16>, vector<8x128xf32> -> vector<8x128xf32>
    %c0_3 = arith.constant 0 : index
    %c0_4 = arith.constant 0 : index
    %5 = vector.load %arg3[%c0_3, %c0_4] : memref<1x128xf32, #tpu.memory_space<vmem>>, vector<1x128xf32>
    %6 = vector.broadcast %5 : vector<1x128xf32> to vector<8x128xf32>
    %7 = arith.addf %4, %6 : vector<8x128xf32>
    %cst_5 = arith.constant 0.000000e+00 : f32
    %8 = vector.broadcast %cst_5 : f32 to vector<8x128xf32>
    %9 = arith.maximumf %7, %8 : vector<8x128xf32>
    %10 = arith.truncf %9 : vector<8x128xf32> to vector<8x128xbf16>
    %c0_6 = arith.constant 0 : index
    %c0_7 = arith.constant 0 : index
    %11 = vector.load %arg4[%c0_6, %c0_7] : memref<128x64xf32, #tpu.memory_space<vmem>>, vector<128x64xf32>
    %12 = arith.truncf %11 : vector<128x64xf32> to vector<128x64xbf16>
    %cst_8 = arith.constant dense<0.000000e+00> : vector<8x64xf32>
    %13 = tpu.matmul %10, %12, %cst_8 {dimension_numbers = #tpu.dot_dimension_numbers<[1], [0], [0], [1], [0, 0, 1, 1], [], []>} : vector<8x128xbf16>, vector<128x64xbf16>, vector<8x64xf32> -> vector<8x64xf32>
    %c0_9 = arith.constant 0 : index
    %c0_10 = arith.constant 0 : index
    %14 = vector.load %arg5[%c0_9, %c0_10] : memref<1x64xf32, #tpu.memory_space<vmem>>, vector<1x64xf32>
    %15 = vector.broadcast %14 : vector<1x64xf32> to vector<8x64xf32>
    %16 = arith.addf %13, %15 : vector<8x64xf32>
    %cst_11 = arith.constant 0.000000e+00 : f32
    %17 = vector.broadcast %cst_11 : f32 to vector<8x64xf32>
    %18 = arith.maximumf %16, %17 : vector<8x64xf32>
    %19 = arith.truncf %18 : vector<8x64xf32> to vector<8x64xbf16>
    %c0_12 = arith.constant 0 : index
    %c0_13 = arith.constant 0 : index
    %20 = vector.load %arg6[%c0_12, %c0_13] : memref<64x6xf32, #tpu.memory_space<vmem>>, vector<64x6xf32>
    %21 = arith.truncf %20 : vector<64x6xf32> to vector<64x6xbf16>
    %cst_14 = arith.constant dense<0.000000e+00> : vector<8x6xf32>
    %22 = tpu.matmul %19, %21, %cst_14 {dimension_numbers = #tpu.dot_dimension_numbers<[1], [0], [0], [1], [0, 0, 1, 1], [], []>} : vector<8x64xbf16>, vector<64x6xbf16>, vector<8x6xf32> -> vector<8x6xf32>
    %c0_15 = arith.constant 0 : index
    %c0_16 = arith.constant 0 : index
    %23 = vector.load %arg7[%c0_15, %c0_16] : memref<1x6xf32, #tpu.memory_space<vmem>>, vector<1x6xf32>
    %24 = vector.broadcast %23 : vector<1x6xf32> to vector<8x6xf32>
    %25 = arith.addf %22, %24 : vector<8x6xf32>
    %26 = arith.negf %25 : vector<8x6xf32>
    %27 = math.exp %26 : vector<8x6xf32>
    %cst_17 = arith.constant 1.000000e+00 : f32
    %28 = vector.broadcast %cst_17 : f32 to vector<8x6xf32>
    %29 = arith.addf %28, %27 : vector<8x6xf32>
    %30 = arith.divf %28, %29 : vector<8x6xf32>
    %c0_18 = arith.constant 0 : index
    %c0_19 = arith.constant 0 : index
    %31 = vector.load %arg8[%c0_18, %c0_19] : memref<8x6xf32, #tpu.memory_space<vmem>>, vector<8x6xf32>
    tpu.vector_store %arg8[%c0_18, %c0_19], %30 {strides = array<i32>} : memref<8x6xf32, #tpu.memory_space<vmem>>, vector<8x6xf32>,
    return
  }
  func.func @transform_0(%arg0: i32) -> (i32, i32) {
    %c0_i32 = arith.constant 0 : i32
    %c0_i32_0 = arith.constant 0 : i32
    return %arg0, %c0_i32 : i32, i32
  }
  func.func @transform_1(%arg0: i32) -> (i32, i32) {
    %c0_i32 = arith.constant 0 : i32
    %c0_i32_0 = arith.constant 0 : i32
    %c0_i32_1 = arith.constant 0 : i32
    return %c0_i32, %c0_i32_0 : i32, i32
  }
  func.func @transform_2(%arg0: i32) -> (i32, i32) {
    %c0_i32 = arith.constant 0 : i32
    %c0_i32_0 = arith.constant 0 : i32
    %c0_i32_1 = arith.constant 0 : i32
    return %c0_i32, %c0_i32_0 : i32, i32
  }
  func.func @transform_3(%arg0: i32) -> (i32, i32) {
    %c0_i32 = arith.constant 0 : i32
    %c0_i32_0 = arith.constant 0 : i32
    %c0_i32_1 = arith.constant 0 : i32
    return %c0_i32, %c0_i32_0 : i32, i32
  }
  func.func @transform_4(%arg0: i32) -> (i32, i32) {
    %c0_i32 = arith.constant 0 : i32
    %c0_i32_0 = arith.constant 0 : i32
    %c0_i32_1 = arith.constant 0 : i32
    return %c0_i32, %c0_i32_0 : i32, i32
  }
  func.func @transform_5(%arg0: i32) -> (i32, i32) {
    %c0_i32 = arith.constant 0 : i32
    %c0_i32_0 = arith.constant 0 : i32
    %c0_i32_1 = arith.constant 0 : i32
    return %c0_i32, %c0_i32_0 : i32, i32
  }
  func.func @transform_6(%arg0: i32) -> (i32, i32) {
    %c0_i32 = arith.constant 0 : i32
    %c0_i32_0 = arith.constant 0 : i32
    %c0_i32_1 = arith.constant 0 : i32
    return %c0_i32, %c0_i32_0 : i32, i32
  }
  func.func @transform_7(%arg0: i32) -> (i32, i32) {
    %c0_i32 = arith.constant 0 : i32
    %c0_i32_0 = arith.constant 0 : i32
    return %arg0, %c0_i32 : i32, i32
  }
}

</mosaic_0001>

<bundles_post_ra>
// kernel: tpu_custom_call.1
= control target key start
LH: loop header
LB: loop body
LE: loop exit
PB: predicated region body
PF: predicated region fallthrough
CT: control target
= control target key end

     0   :  { %12 = vsyncpa [#allocation3], 0  ;;  %s1703_s0 = inlined_call_operand.hbm [shape: f32[8,3840], index: 0, kind: input, shape index: {}]   ;;  %s1704_s1 = inlined_call_operand.hbm [shape: f32[3840,128], index: 1, kind: input, shape index: {}]   ;;  %s1705_s2 = inlined_call_operand.hbm [shape: f32[1,128], index: 2, kind: input, shape index: {}]   ;;  %s1706_s3 = inlined_call_operand.vmem [shape: f32[128,64], index: 3, kind: input, shape index: {}]   ;;  %s1707_s4 = inlined_call_operand.hbm [shape: f32[1,64], index: 4, kind: input, shape index: {}]   ;;  %s1708_s5 = inlined_call_operand.vmem [shape: f32[64,6], index: 5, kind: input, shape index: {}]   ;;  %s1709_s6 = inlined_call_operand.hbm [shape: f32[1,6], index: 6, kind: input, shape index: {}]   ;;  %s1710_s7 = inlined_call_operand.hbm [shape: f32[8,6], index: 7, kind: output, shape index: {}]  }
   0x1   :  { %13 = vsyncpa [#allocation6], 0 }
   0x2   :  { %14 = vsyncpa [#allocation9], 0  ;;  %s31_s26 = sshll.u32 %s1704_s1, 4  ;;  %s32_s26 = int_to_ptr.hbm [resolvable:$true] %s31_s26 }
   0x3   :  { %15 = vsyncpa [#allocation4], 0  ;;  %s1559_s27 = smov [#allocation5]   ;;  %s58_s8 = sshll.u32 %s1707_s4, 4  ;;  %s59_s8 = int_to_ptr.hbm [resolvable:$true] %s58_s8 }
   0x4   :  { %s33_s28 = sshll.u32 %s1559_s27, 4  ;;  %s1560_s9 = smov 128   ;;  %s34_s28 = int_to_ptr.vmem [resolvable:$true] %s33_s28 }
   0x5   :  { %s1561_s10 = smov 8   ;;  %s1562_s11 = smov [#allocation8]  }
   0x6   :  { %39 = dma.hbm_to_vmem [thread:$0]  %s32_s26, 61440, %s34_s28, [#allocation6], %s1560_s9, %s1560_s9, %s1561_s10  }
   0x7   :  { %s60_s12 = sshll.u32 %s1562_s11, 4  ;;  %s21_s15 = sshll.u32 %s1703_s0, 4  ;;  %s61_s12 = int_to_ptr.vmem [resolvable:$true] %s60_s12  ;;  %s22_s15 = int_to_ptr.hbm [resolvable:$true] %s21_s15 }
   0x8   :  { %63 = dma.hbm_to_vmem [thread:$0]  %s59_s8, 16, %s61_s12, [#allocation9]  }
   0x9   :  { %s45_s17 = sshll.u32 %s1705_s2, 4  ;;  %s1563_s18 = smov [#allocation2]   ;;  %s46_s17 = int_to_ptr.hbm [resolvable:$true] %s45_s17 }
   0xa   :  { %s23_s19 = sshll.u32 %s1563_s18, 4  ;;  %s1564_s4 = smov [#allocation7]   ;;  %s24_s19 = int_to_ptr.vmem [resolvable:$true] %s23_s19 }
   0xb   :  { %26 = dma.hbm_to_vmem [thread:$0]  %s22_s15, 3840, %s24_s19, [#allocation3]  }
   0xc   :  { %s47_s20 = sshll.u32 %s1564_s4, 4  ;;  %s71_s23 = sshll.u32 %s1709_s6, 4  ;;  %s48_s20 = int_to_ptr.vmem [resolvable:$true] %s47_s20  ;;  %s72_s23 = int_to_ptr.hbm [resolvable:$true] %s71_s23 }
   0xd   :  { %50 = dma.hbm_to_vmem [thread:$0]  %s46_s17, 16, %s48_s20, [#allocation6]  }
   0xe   :  { %s1565_s0 = smov [#allocation10]  }
   0xf   :  { %s73_s24 = sshll.u32 %s1565_s0, 4  ;;  %s74_s24 = int_to_ptr.vmem [resolvable:$true] %s73_s24 }
  0x10   :  { %76 = dma.hbm_to_vmem [thread:$0]  %s72_s23, 16, %s74_s24, [#allocation9]  }
  0x11   :  { %1551 = dma.done.wait [#allocation3], 3840  }
  0x12   :  { %1552 = vsyncadd [#allocation3], 4294963456 }
  0x13   :  { %1553 = dma.done.wait [#allocation6], 61456  }
  0x14   :  { %1554 = vsyncadd [#allocation6], 4294905840 }
  0x15   :  { %1555 = dma.done.wait [#allocation9], 32  }
  0x16   :  { %1556 = vsyncadd [#allocation9], 4294967264  ;;  %v172_v0 = vld [vmem:[#allocation5 + $0x70] sm:$0xff]  ;;  %v173_v1 = vld [vmem:[#allocation5 + $0x78] sm:$0xff]  ;;  %vm1333_vm0 = vcmask 523264   ;;  %s1378_s20 = sshll.u32 %s1710_s7, 4  ;;  %s1379_s20 = int_to_ptr.hbm [resolvable:$true] %s1378_s20 }
  0x17   :  { %v188_v2 = vld [vmem:[#allocation5 + $0xf0] sm:$0xff]  ;;  %v645_v3 = vpack.c.bf16 %v173_v1, %v172_v0  ;;  %v189_v4 = vld [vmem:[#allocation5 + $0xf8] sm:$0xff]  ;;  %v170_v11 = vld [vmem:[#allocation5 + $0x60] sm:$0xff]  ;;  %vm1369_vm4 = vcmask 48128  }
  0x18   :  { %v204_v5 = vld [vmem:[#allocation5 + $0x170] sm:$0xff]  ;;  %v205_v6 = vld [vmem:[#allocation5 + $0x178] sm:$0xff]  ;;  %v653_v7 = vpack.c.bf16 %v189_v4, %v188_v2  ;;  %v171_v13 = vld [vmem:[#allocation5 + $0x68] sm:$0xff] }
  0x19   :  { %v661_v8 = vpack.c.bf16 %v205_v6, %v204_v5  ;;  %v220_v9 = vld [vmem:[#allocation5 + $0x1f0] sm:$0xff]  ;;  %v221_v10 = vld [vmem:[#allocation5 + $0x1f8] sm:$0xff]  ;;  %882 = vmatpush.bf16.msra.mxu0 %v645_v3  ;;  %v186_v14 = vld [vmem:[#allocation5 + $0xe0] sm:$0xff]  ;;  %v644_v16 = vpack.c.bf16 %v171_v13, %v170_v11 }
  0x1a   :  { %v669_v12 = vpack.c.bf16 %v221_v10, %v220_v9  ;;  %v187_v15 = vld [vmem:[#allocation5 + $0xe8] sm:$0xff]  ;;  %895 = vmatpush.bf16.msra.mxu1 %v653_v7  ;;  %v202_v18 = vld [vmem:[#allocation5 + $0x160] sm:$0xff]  ;;  %v168_v23 = vld [vmem:[#allocation5 + $0x50] sm:$0xff] }
  0x1b   :  { %908 = vmatpush.bf16.msra.mxu2 %v661_v8  ;;  %v652_v17 = vpack.c.bf16 %v187_v15, %v186_v14  ;;  %v203_v19 = vld [vmem:[#allocation5 + $0x168] sm:$0xff]  ;;  %v218_v20 = vld [vmem:[#allocation5 + $0x1e0] sm:$0xff]  ;;  %v169_v24 = vld [vmem:[#allocation5 + $0x58] sm:$0xff] }
  0x1c   :  { %921 = vmatpush.bf16.msra.mxu3 %v669_v12  ;;  %v660_v21 = vpack.c.bf16 %v203_v19, %v202_v18  ;;  %v219_v22 = vld [vmem:[#allocation5 + $0x1e8] sm:$0xff]  ;;  %v184_v26 = vld [vmem:[#allocation5 + $0xd0] sm:$0xff]  ;;  %v185_v27 = vld [vmem:[#allocation5 + $0xd8] sm:$0xff]  ;;  %v643_v29 = vpack.c.bf16 %v169_v24, %v168_v23 }
  0x1d   :  { %v668_v25 = vpack.c.bf16 %v219_v22, %v218_v20  ;;  %v200_v28 = vld [vmem:[#allocation5 + $0x150] sm:$0xff]  ;;  %883 = vmatpush.bf16.msra.mxu0 %v644_v16  ;;  %v201_v30 = vld [vmem:[#allocation5 + $0x158] sm:$0xff]  ;;  %v651_v33 = vpack.c.bf16 %v185_v27, %v184_v26  ;;  %v166_v35 = vld [vmem:[#allocation5 + $0x40] sm:$0xff] }
  0x1e   :  { %v216_v31 = vld [vmem:[#allocation5 + $0x1d0] sm:$0xff]  ;;  %v217_v32 = vld [vmem:[#allocation5 + $0x1d8] sm:$0xff]  ;;  %896 = vmatpush.bf16.msra.mxu1 %v652_v17  ;;  %v659_v34 = vpack.c.bf16 %v201_v30, %v200_v28  ;;  %v167_v36 = vld [vmem:[#allocation5 + $0x48] sm:$0xff] }
  0x1f   :  { %909 = vmatpush.bf16.msra.mxu2 %v660_v21  ;;  %v182_v37 = vld [vmem:[#allocation5 + $0xc0] sm:$0xff]  ;;  %v667_v38 = vpack.c.bf16 %v217_v32, %v216_v31  ;;  %v183_v39 = vld [vmem:[#allocation5 + $0xc8] sm:$0xff]  ;;  %v642_v44 = vpack.c.bf16 %v167_v36, %v166_v35  ;;  %v164_v47 = vld [vmem:[#allocation5 + $0x30] sm:$0xff] }
  0x20   :  { %922 = vmatpush.bf16.msra.mxu3 %v668_v25  ;;  %v198_v40 = vld [vmem:[#allocation5 + $0x140] sm:$0xff]  ;;  %v199_v41 = vld [vmem:[#allocation5 + $0x148] sm:$0xff]  ;;  %v650_v45 = vpack.c.bf16 %v183_v39, %v182_v37  ;;  %v165_v48 = vld [vmem:[#allocation5 + $0x38] sm:$0xff] }
  0x21   :  { %v214_v42 = vld [vmem:[#allocation5 + $0x1c0] sm:$0xff]  ;;  %v215_v43 = vld [vmem:[#allocation5 + $0x1c8] sm:$0xff]  ;;  %884 = vmatpush.bf16.msra.mxu0 %v643_v29  ;;  %v658_v46 = vpack.c.bf16 %v199_v41, %v198_v40  ;;  %v180_v49 = vld [vmem:[#allocation5 + $0xb0] sm:$0xff]  ;;  %v641_v56 = vpack.c.bf16 %v165_v48, %v164_v47 }
  0x22   :  { %897 = vmatpush.bf16.msra.mxu1 %v651_v33  ;;  %v666_v50 = vpack.c.bf16 %v215_v43, %v214_v42  ;;  %v181_v51 = vld [vmem:[#allocation5 + $0xb8] sm:$0xff]  ;;  %v196_v52 = vld [vmem:[#allocation5 + $0x130] sm:$0xff]  ;;  %v162_v59 = vld [vmem:[#allocation5 + $0x20] sm:$0xff] }
  0x23   :  { %910 = vmatpush.bf16.msra.mxu2 %v659_v34  ;;  %v197_v53 = vld [vmem:[#allocation5 + $0x138] sm:$0xff]  ;;  %v212_v54 = vld [vmem:[#allocation5 + $0x1b0] sm:$0xff]  ;;  %v649_v57 = vpack.c.bf16 %v181_v51, %v180_v49  ;;  %v163_v60 = vld [vmem:[#allocation5 + $0x28] sm:$0xff] }
  0x24   :  { %923 = vmatpush.bf16.msra.mxu3 %v667_v38  ;;  %v213_v55 = vld [vmem:[#allocation5 + $0x1b8] sm:$0xff]  ;;  %v657_v58 = vpack.c.bf16 %v197_v53, %v196_v52  ;;  %v178_v61 = vld [vmem:[#allocation5 + $0xa0] sm:$0xff]  ;;  %v179_v63 = vld [vmem:[#allocation5 + $0xa8] sm:$0xff]  ;;  %v640_v4 = vpack.c.bf16 %v163_v60, %v162_v59 }
  0x25   :  { %885 = vmatpush.bf16.msra.mxu0 %v642_v44  ;;  %v665_v62 = vpack.c.bf16 %v213_v55, %v212_v54  ;;  %v194_v0 = vld [vmem:[#allocation5 + $0x120] sm:$0xff]  ;;  %v195_v1 = vld [vmem:[#allocation5 + $0x128] sm:$0xff]  ;;  %v648_v5 = vpack.c.bf16 %v179_v63, %v178_v61  ;;  %v160_v7 = vld [vmem:[#allocation5 + $0x10] sm:$0xff] }
  0x26   :  { %898 = vmatpush.bf16.msra.mxu1 %v650_v45  ;;  %v210_v2 = vld [vmem:[#allocation5 + $0x1a0] sm:$0xff]  ;;  %v211_v3 = vld [vmem:[#allocation5 + $0x1a8] sm:$0xff]  ;;  %v656_v6 = vpack.c.bf16 %v195_v1, %v194_v0  ;;  %v161_v8 = vld [vmem:[#allocation5 + $0x18] sm:$0xff] }
  0x27   :  { %911 = vmatpush.bf16.msra.mxu2 %v658_v46  ;;  %v176_v9 = vld [vmem:[#allocation5 + $0x90] sm:$0xff]  ;;  %v664_v10 = vpack.c.bf16 %v211_v3, %v210_v2  ;;  %v177_v11 = vld [vmem:[#allocation5 + $0x98] sm:$0xff]  ;;  %v639_v16 = vpack.c.bf16 %v161_v8, %v160_v7  ;;  %v158_v17 = vld [vmem:[#allocation5] sm:$0xff] }
  0x28   :  { %924 = vmatpush.bf16.msra.mxu3 %v666_v50  ;;  %v192_v12 = vld [vmem:[#allocation5 + $0x110] sm:$0xff]  ;;  %v193_v13 = vld [vmem:[#allocation5 + $0x118] sm:$0xff]  ;;  %v159_v18 = vld [vmem:[#allocation5 + $0x8] sm:$0xff]  ;;  %v647_v19 = vpack.c.bf16 %v177_v11, %v176_v9 }
  0x29   :  { %886 = vmatpush.bf16.msra.mxu0 %v641_v56  ;;  %v208_v14 = vld [vmem:[#allocation5 + $0x190] sm:$0xff]  ;;  %v209_v15 = vld [vmem:[#allocation5 + $0x198] sm:$0xff]  ;;  %v655_v20 = vpack.c.bf16 %v193_v13, %v192_v12  ;;  %v174_v21 = vld [vmem:[#allocation5 + $0x80] sm:$0xff]  ;;  %v638_v31 = vpack.c.bf16 %v159_v18, %v158_v17 }
  0x2a   :  { %899 = vmatpush.bf16.msra.mxu1 %v649_v57  ;;  %v175_v22 = vld [vmem:[#allocation5 + $0x88] sm:$0xff]  ;;  %v190_v23 = vld [vmem:[#allocation5 + $0x100] sm:$0xff]  ;;  %v663_v24 = vpack.c.bf16 %v209_v15, %v208_v14  ;;  %v236_v26 = vld [vmem:[#allocation5 + $0x270] sm:$0xff] }
  0x2b   :  { %912 = vmatpush.bf16.msra.mxu2 %v657_v58  ;;  %v191_v25 = vld [vmem:[#allocation5 + $0x108] sm:$0xff]  ;;  %v237_v27 = vld [vmem:[#allocation5 + $0x278] sm:$0xff]  ;;  %v252_v28 = vld [vmem:[#allocation5 + $0x2f0] sm:$0xff]  ;;  %v646_v35 = vpack.c.bf16 %v175_v22, %v174_v21 }
  0x2c   :  { %925 = vmatpush.bf16.msra.mxu3 %v665_v62  ;;  %v253_v29 = vld [vmem:[#allocation5 + $0x2f8] sm:$0xff]  ;;  %v268_v30 = vld [vmem:[#allocation5 + $0x370] sm:$0xff]  ;;  %v206_v33 = vld [vmem:[#allocation5 + $0x180] sm:$0xff]  ;;  %v654_v36 = vpack.c.bf16 %v191_v25, %v190_v23  ;;  %v677_v39 = vpack.c.bf16 %v237_v27, %v236_v26 }
  0x2d   :  { %887 = vmatpush.bf16.msra.mxu0 %v640_v4  ;;  %v269_v32 = vld [vmem:[#allocation5 + $0x378] sm:$0xff]  ;;  %v207_v34 = vld [vmem:[#allocation5 + $0x188] sm:$0xff]  ;;  %v284_v37 = vld [vmem:[#allocation5 + $0x3f0] sm:$0xff]  ;;  %v685_v40 = vpack.c.bf16 %v253_v29, %v252_v28 }
  0x2e   :  { %900 = vmatpush.bf16.msra.mxu1 %v648_v5  ;;  %v285_v38 = vld [vmem:[#allocation5 + $0x3f8] sm:$0xff]  ;;  %v234_v41 = vld [vmem:[#allocation5 + $0x260] sm:$0xff]  ;;  %v693_v42 = vpack.c.bf16 %v269_v32, %v268_v30  ;;  %v662_v43 = vpack.c.bf16 %v207_v34, %v206_v33  ;;  %v235_v44 = vld [vmem:[#allocation5 + $0x268] sm:$0xff] }
  0x2f   :  { %913 = vmatpush.bf16.msra.mxu2 %v656_v6  ;;  %v250_v45 = vld [vmem:[#allocation5 + $0x2e0] sm:$0xff]  ;;  %v251_v46 = vld [vmem:[#allocation5 + $0x2e8] sm:$0xff]  ;;  %v701_v47 = vpack.c.bf16 %v285_v38, %v284_v37  ;;  %v676_v52 = vpack.c.bf16 %v235_v44, %v234_v41  ;;  %v232_v54 = vld [vmem:[#allocation5 + $0x250] sm:$0xff] }
  0x30   :  { %926 = vmatpush.bf16.msra.mxu3 %v664_v10  ;;  %v266_v48 = vld [vmem:[#allocation5 + $0x360] sm:$0xff]  ;;  %v267_v49 = vld [vmem:[#allocation5 + $0x368] sm:$0xff]  ;;  %v684_v53 = vpack.c.bf16 %v251_v46, %v250_v45  ;;  %v233_v55 = vld [vmem:[#allocation5 + $0x258] sm:$0xff] }
  0x31   :  { %888 = vmatpush.bf16.msra.mxu0 %v639_v16  ;;  %v282_v50 = vld [vmem:[#allocation5 + $0x3e0] sm:$0xff]  ;;  %v283_v51 = vld [vmem:[#allocation5 + $0x3e8] sm:$0xff]  ;;  %v692_v56 = vpack.c.bf16 %v267_v49, %v266_v48  ;;  %v248_v57 = vld [vmem:[#allocation5 + $0x2d0] sm:$0xff]  ;;  %v675_v3 = vpack.c.bf16 %v233_v55, %v232_v54 }
  0x32   :  { %901 = vmatpush.bf16.msra.mxu1 %v647_v19  ;;  %v249_v58 = vld [vmem:[#allocation5 + $0x2d8] sm:$0xff]  ;;  %v100_v59 = vld [vmem:[#allocation2 + $0x10] sm:$0xff]  ;;  %v700_v60 = vpack.c.bf16 %v283_v51, %v282_v50  ;;  %v264_v61 = vld [vmem:[#allocation5 + $0x350] sm:$0xff] }
  0x33   :  { %914 = vmatpush.bf16.msra.mxu2 %v655_v20  ;;  %v265_v62 = vld [vmem:[#allocation5 + $0x358] sm:$0xff]  ;;  %v130_v63 = vpack.c.bf16 %v100_v59, %v100_v59  ;;  %v280_v0 = vld [vmem:[#allocation5 + $0x3d0] sm:$0xff]  ;;  %v230_v2 = vld [vmem:[#allocation5 + $0x240] sm:$0xff]  ;;  %v683_v4 = vpack.c.bf16 %v249_v58, %v248_v57 }
  0x34   :  { %927 = vmatpush.bf16.msra.mxu3 %v663_v24  ;;  %v281_v1 = vld [vmem:[#allocation5 + $0x3d8] sm:$0xff]  ;;  %v231_v5 = vld [vmem:[#allocation5 + $0x248] sm:$0xff]  ;;  %v98_v6 = vld [vmem:[#allocation2] sm:$0xff]  ;;  %v691_v8 = vpack.c.bf16 %v265_v62, %v264_v61 }
  0x35   :  { %889 = vmatpush.bf16.msra.mxu0 %v638_v31  ;;  %v101_v7 = vld [vmem:[#allocation2 + $0x18] sm:$0xff]  ;;  %v246_v9 = vld [vmem:[#allocation5 + $0x2c0] sm:$0xff]  ;;  %v128_v11 = vpack.c.bf16 %v98_v6, %v98_v6  ;;  %v99_v13 = vld [vmem:[#allocation2 + $0x8] sm:$0xff]  ;;  %v699_v14 = vpack.c.bf16 %v281_v1, %v280_v0  ;;  %v674_v20 = vpack.c.bf16 %v231_v5, %v230_v2 }
  0x36   :  { %902 = vmatpush.bf16.msra.mxu1 %v646_v35  ;;  %v247_v10 = vld [vmem:[#allocation5 + $0x2c8] sm:$0xff]  ;;  %v131_v12 = vpack.c.bf16 %v101_v7, %v101_v7  ;;  %v262_v15 = vld [vmem:[#allocation5 + $0x340] sm:$0xff]  ;;  %v129_v17 = vpack.c.bf16 %v99_v13, %v99_v13  ;;  %v228_v22 = vld [vmem:[#allocation5 + $0x230] sm:$0xff] }
  0x37   :  { %915 = vmatpush.bf16.msra.mxu2 %v654_v36  ;;  %v263_v16 = vld [vmem:[#allocation5 + $0x348] sm:$0xff]  ;;  %v278_v18 = vld [vmem:[#allocation5 + $0x3c0] sm:$0xff]  ;;  %v682_v21 = vpack.c.bf16 %v247_v10, %v246_v9  ;;  %v229_v24 = vld [vmem:[#allocation5 + $0x238] sm:$0xff] }
  0x38   :  { %928 = vmatpush.bf16.msra.mxu3 %v662_v43  ;;  %v279_v19 = vld [vmem:[#allocation5 + $0x3c8] sm:$0xff]  ;;  %890 = vmatmul.bf16.vlgmr.msra.gmra.mxu0 %v128_v11  ;;  %v690_v23 = vpack.c.bf16 %v263_v16, %v262_v15  ;;  %v244_v25 = vld [vmem:[#allocation5 + $0x2b0] sm:$0xff]  ;;  %v245_v26 = vld [vmem:[#allocation5 + $0x2b8] sm:$0xff]  ;;  %v673_v32 = vpack.c.bf16 %v229_v24, %v228_v22 }
  0x39   :  { %934 = vmatpush.bf16.msrb.mxu0 %v677_v39  ;;  %903 = vmatmul.bf16.vlgmr.msra.gmra.mxu1 %v129_v17  ;;  %v698_v27 = vpack.c.bf16 %v279_v19, %v278_v18  ;;  %v260_v28 = vld [vmem:[#allocation5 + $0x330] sm:$0xff]  ;;  %v261_v29 = vld [vmem:[#allocation5 + $0x338] sm:$0xff]  ;;  %v681_v33 = vpack.c.bf16 %v245_v26, %v244_v25  ;;  %v226_v34 = vld [vmem:[#allocation5 + $0x220] sm:$0xff] }
  0x3a   :  { %947 = vmatpush.bf16.msrb.mxu1 %v685_v40  ;;  %916 = vmatmul.bf16.vlgmr.msra.gmra.mxu2 %v130_v63  ;;  %v276_v30 = vld [vmem:[#allocation5 + $0x3b0] sm:$0xff]  ;;  %v277_v31 = vld [vmem:[#allocation5 + $0x3b8] sm:$0xff]  ;;  %v689_v35 = vpack.c.bf16 %v261_v29, %v260_v28  ;;  %v227_v36 = vld [vmem:[#allocation5 + $0x228] sm:$0xff] }
  0x3b   :  { %960 = vmatpush.bf16.msrb.mxu2 %v693_v42  ;;  %929 = vmatmul.bf16.vlgmr.msra.gmra.mxu3 %v131_v12  ;;  %v242_v37 = vld [vmem:[#allocation5 + $0x2a0] sm:$0xff]  ;;  %v243_v38 = vld [vmem:[#allocation5 + $0x2a8] sm:$0xff]  ;;  %v697_v39 = vpack.c.bf16 %v277_v31, %v276_v30  ;;  %v672_v44 = vpack.c.bf16 %v227_v36, %v226_v34  ;;  %v224_v46 = vld [vmem:[#allocation5 + $0x210] sm:$0xff] }
  0x3c   :  { %973 = vmatpush.bf16.msrb.mxu3 %v701_v47  ;;  %v258_v40 = vld [vmem:[#allocation5 + $0x320] sm:$0xff]  ;;  %v259_v41 = vld [vmem:[#allocation5 + $0x328] sm:$0xff]  ;;  %v680_v45 = vpack.c.bf16 %v243_v38, %v242_v37  ;;  %v225_v48 = vld [vmem:[#allocation5 + $0x218] sm:$0xff] }
  0x3d   :  { %935 = vmatpush.bf16.msrb.mxu0 %v676_v52  ;;  %v274_v42 = vld [vmem:[#allocation5 + $0x3a0] sm:$0xff]  ;;  %v275_v43 = vld [vmem:[#allocation5 + $0x3a8] sm:$0xff]  ;;  %v688_v47 = vpack.c.bf16 %v259_v41, %v258_v40  ;;  %v240_v49 = vld [vmem:[#allocation5 + $0x290] sm:$0xff]  ;;  %v671_v57 = vpack.c.bf16 %v225_v48, %v224_v46 }
  0x3e   :  { %948 = vmatpush.bf16.msrb.mxu1 %v684_v53  ;;  %v241_v50 = vld [vmem:[#allocation5 + $0x298] sm:$0xff]  ;;  %v696_v51 = vpack.c.bf16 %v275_v43, %v274_v42  ;;  %v256_v52 = vld [vmem:[#allocation5 + $0x310] sm:$0xff]  ;;  %v223_v59 = vld [vmem:[#allocation5 + $0x208] sm:$0xff] }
  0x3f   :  { %961 = vmatpush.bf16.msrb.mxu2 %v692_v56  ;;  %v257_v53 = vld [vmem:[#allocation5 + $0x318] sm:$0xff]  ;;  %v272_v54 = vld [vmem:[#allocation5 + $0x390] sm:$0xff]  ;;  %v222_v56 = vld [vmem:[#allocation5 + $0x200] sm:$0xff]  ;;  %v679_v58 = vpack.c.bf16 %v241_v50, %v240_v49 }
  0x40   :  { %974 = vmatpush.bf16.msrb.mxu3 %v700_v60  ;;  %v273_v55 = vld [vmem:[#allocation5 + $0x398] sm:$0xff]  ;;  %v238_v60 = vld [vmem:[#allocation5 + $0x280] sm:$0xff]  ;;  %v239_v61 = vld [vmem:[#allocation5 + $0x288] sm:$0xff]  ;;  %v687_v62 = vpack.c.bf16 %v257_v53, %v256_v52  ;;  %v670_v9 = vpack.c.bf16 %v223_v59, %v222_v56 }
  0x41   :  { %936 = vmatpush.bf16.msrb.mxu0 %v675_v3  ;;  %v254_v63 = vld [vmem:[#allocation5 + $0x300] sm:$0xff]  ;;  %v255_v0 = vld [vmem:[#allocation5 + $0x308] sm:$0xff]  ;;  %v300_v1 = vld [vmem:[#allocation5 + $0x470] sm:$0xff]  ;;  %v695_v2 = vpack.c.bf16 %v273_v55, %v272_v54  ;;  %v678_v10 = vpack.c.bf16 %v239_v61, %v238_v60 }
  0x42   :  { %949 = vmatpush.bf16.msrb.mxu1 %v683_v4  ;;  %v301_v3 = vld [vmem:[#allocation5 + $0x478] sm:$0xff]  ;;  %v316_v4 = vld [vmem:[#allocation5 + $0x4f0] sm:$0xff]  ;;  %v271_v11 = vld [vmem:[#allocation5 + $0x388] sm:$0xff] }
  0x43   :  { %962 = vmatpush.bf16.msrb.mxu2 %v691_v8  ;;  %v317_v5 = vld [vmem:[#allocation5 + $0x4f8] sm:$0xff]  ;;  %v332_v6 = vld [vmem:[#allocation5 + $0x570] sm:$0xff]  ;;  %v270_v8 = vld [vmem:[#allocation5 + $0x380] sm:$0xff]  ;;  %v709_v15 = vpack.c.bf16 %v301_v3, %v300_v1 }
  0x44   :  { %975 = vmatpush.bf16.msrb.mxu3 %v699_v14  ;;  %v333_v7 = vld [vmem:[#allocation5 + $0x578] sm:$0xff]  ;;  %v348_v12 = vld [vmem:[#allocation5 + $0x5f0] sm:$0xff]  ;;  %v686_v14 = vpack.c.bf16 %v255_v0, %v254_v63  ;;  %v298_v17 = vld [vmem:[#allocation5 + $0x460] sm:$0xff]  ;;  %v717_v19 = vpack.c.bf16 %v317_v5, %v316_v4  ;;  %v694_v24 = vpack.c.bf16 %v271_v11, %v270_v8 }
  0x45   :  { %937 = vmatpush.bf16.msrb.mxu0 %v674_v20  ;;  %v102_v13 = vld [vmem:[#allocation2 + $0x20] sm:$0xff]  ;;  %v349_v16 = vld [vmem:[#allocation5 + $0x5f8] sm:$0xff]  ;;  %v104_v18 = vld [vmem:[#allocation2 + $0x30] sm:$0xff]  ;;  %v725_v20 = vpack.c.bf16 %v333_v7, %v332_v6 }
  0x46   :  { %950 = vmatpush.bf16.msrb.mxu1 %v682_v21  ;;  %v299_v21 = vld [vmem:[#allocation5 + $0x468] sm:$0xff]  ;;  %v314_v22 = vld [vmem:[#allocation5 + $0x4e0] sm:$0xff]  ;;  %v132_v28 = vpack.c.bf16 %v102_v13, %v102_v13  ;;  %v733_v29 = vpack.c.bf16 %v349_v16, %v348_v12  ;;  %v134_v30 = vpack.c.bf16 %v104_v18, %v104_v18  ;;  %v296_v38 = vld [vmem:[#allocation5 + $0x450] sm:$0xff] }
  0x47   :  { %963 = vmatpush.bf16.msrb.mxu2 %v690_v23  ;;  %v103_v23 = vld [vmem:[#allocation2 + $0x28] sm:$0xff]  ;;  %v315_v25 = vld [vmem:[#allocation5 + $0x4e8] sm:$0xff]  ;;  %v330_v26 = vld [vmem:[#allocation5 + $0x560] sm:$0xff] }
  0x48   :  { %976 = vmatpush.bf16.msrb.mxu3 %v698_v27  ;;  %v331_v27 = vld [vmem:[#allocation5 + $0x568] sm:$0xff]  ;;  %v716_v36 = vpack.c.bf16 %v315_v25, %v314_v22  ;;  %v312_v40 = vld [vmem:[#allocation5 + $0x4d0] sm:$0xff]  ;;  %v313_v42 = vld [vmem:[#allocation5 + $0x4d8] sm:$0xff] }
  0x49   :  { %938 = vmatpush.bf16.msrb.mxu0 %v673_v32  ;;  %v105_v31 = vld [vmem:[#allocation2 + $0x38] sm:$0xff]  ;;  %v708_v32 = vpack.c.bf16 %v299_v21, %v298_v17  ;;  %v724_v37 = vpack.c.bf16 %v331_v27, %v330_v26  ;;  %v328_v43 = vld [vmem:[#allocation5 + $0x550] sm:$0xff]  ;;  %v345_v48 = vld [vmem:[#allocation5 + $0x5d8] sm:$0xff]  ;;  %v715_v49 = vpack.c.bf16 %v313_v42, %v312_v40 }
  0x4a   :  { %951 = vmatpush.bf16.msrb.mxu1 %v681_v33  ;;  %v346_v33 = vld [vmem:[#allocation5 + $0x5e0] sm:$0xff]  ;;  %v347_v34 = vld [vmem:[#allocation5 + $0x5e8] sm:$0xff]  ;;  %v135_v41 = vpack.c.bf16 %v105_v31, %v105_v31  ;;  %v292_v63 = vld [vmem:[#allocation5 + $0x430] sm:$0xff] }
  0x4b   :  { %964 = vmatpush.bf16.msrb.mxu2 %v689_v35  ;;  %v133_v35 = vpack.c.bf16 %v103_v23, %v103_v23  ;;  %v295_v52 = vld [vmem:[#allocation5 + $0x448] sm:$0xff]  ;;  %v310_v53 = vld [vmem:[#allocation5 + $0x4c0] sm:$0xff]  ;;  %v293_v0 = vld [vmem:[#allocation5 + $0x438] sm:$0xff] }
  0x4c   :  { %977 = vmatpush.bf16.msrb.mxu3 %v697_v39  ;;  %v297_v39 = vld [vmem:[#allocation5 + $0x458] sm:$0xff]  ;;  %v311_v54 = vld [vmem:[#allocation5 + $0x4c8] sm:$0xff]  ;;  %v326_v55 = vld [vmem:[#allocation5 + $0x540] sm:$0xff]  ;;  %v705_v6 = vpack.c.bf16 %v293_v0, %v292_v63 }
  0x4d   :  { %939 = vmatpush.bf16.msrb.mxu0 %v672_v44  ;;  %v329_v44 = vld [vmem:[#allocation5 + $0x558] sm:$0xff]  ;;  %v707_v46 = vpack.c.bf16 %v297_v39, %v296_v38  ;;  %v327_v56 = vld [vmem:[#allocation5 + $0x548] sm:$0xff]  ;;  %v342_v59 = vld [vmem:[#allocation5 + $0x5c0] sm:$0xff]  ;;  %v714_v61 = vpack.c.bf16 %v311_v54, %v310_v53 }
  0x4e   :  { %952 = vmatpush.bf16.msrb.mxu1 %v680_v45  ;;  %v732_v45 = vpack.c.bf16 %v347_v34, %v346_v33  ;;  %v723_v50 = vpack.c.bf16 %v329_v44, %v328_v43  ;;  %v343_v60 = vld [vmem:[#allocation5 + $0x5c8] sm:$0xff]  ;;  %v308_v1 = vld [vmem:[#allocation5 + $0x4b0] sm:$0xff]  ;;  %v325_v4 = vld [vmem:[#allocation5 + $0x538] sm:$0xff] }
  0x4f   :  { %965 = vmatpush.bf16.msrb.mxu2 %v688_v47  ;;  %v344_v47 = vld [vmem:[#allocation5 + $0x5d0] sm:$0xff]  ;;  %v730_v5 = vpack.c.bf16 %v343_v60, %v342_v59  ;;  %v341_v8 = vld [vmem:[#allocation5 + $0x5b8] sm:$0xff]  ;;  %v290_v11 = vld [vmem:[#allocation5 + $0x420] sm:$0xff] }
  0x50   :  { %978 = vmatpush.bf16.msrb.mxu3 %v696_v51  ;;  %v294_v51 = vld [vmem:[#allocation5 + $0x440] sm:$0xff]  ;;  %v324_v3 = vld [vmem:[#allocation5 + $0x530] sm:$0xff]  ;;  %v291_v12 = vld [vmem:[#allocation5 + $0x428] sm:$0xff] }
  0x51   :  { %940 = vmatpush.bf16.msrb.mxu0 %v671_v57  ;;  %v731_v57 = vpack.c.bf16 %v345_v48, %v344_v47  ;;  %v340_v7 = vld [vmem:[#allocation5 + $0x5b0] sm:$0xff]  ;;  %v306_v13 = vld [vmem:[#allocation5 + $0x4a0] sm:$0xff]  ;;  %v323_v16 = vld [vmem:[#allocation5 + $0x528] sm:$0xff]  ;;  %v704_v18 = vpack.c.bf16 %v291_v12, %v290_v11 }
  0x52   :  { %953 = vmatpush.bf16.msrb.mxu1 %v679_v58  ;;  %v706_v58 = vpack.c.bf16 %v295_v52, %v294_v51  ;;  %v729_v17 = vpack.c.bf16 %v341_v8, %v340_v7  ;;  %v288_v23 = vld [vmem:[#allocation5 + $0x410] sm:$0xff]  ;;  %v305_v26 = vld [vmem:[#allocation5 + $0x498] sm:$0xff]  ;;  %v286_v33 = vld [vmem:[#allocation5 + $0x400] sm:$0xff] }
  0x53   :  { %966 = vmatpush.bf16.msrb.mxu2 %v687_v62  ;;  %v722_v62 = vpack.c.bf16 %v327_v56, %v326_v55  ;;  %v304_v25 = vld [vmem:[#allocation5 + $0x490] sm:$0xff]  ;;  %v287_v34 = vld [vmem:[#allocation5 + $0x408] sm:$0xff]  ;;  %v318_v39 = vld [vmem:[#allocation5 + $0x500] sm:$0xff] }
  0x54   :  { %979 = vmatpush.bf16.msrb.mxu3 %v695_v2  ;;  %v309_v2 = vld [vmem:[#allocation5 + $0x4b8] sm:$0xff]  ;;  %v320_v27 = vld [vmem:[#allocation5 + $0x510] sm:$0xff]  ;;  %v303_v38 = vld [vmem:[#allocation5 + $0x488] sm:$0xff]  ;;  %v702_v47 = vpack.c.bf16 %v287_v34, %v286_v33 }
  0x55   :  { %941 = vmatpush.bf16.msrb.mxu0 %v670_v9  ;;  %v713_v9 = vpack.c.bf16 %v309_v2, %v308_v1  ;;  %v319_v40 = vld [vmem:[#allocation5 + $0x508] sm:$0xff]  ;;  %v365_v42 = vld [vmem:[#allocation5 + $0x678] sm:$0xff]  ;;  %v380_v44 = vld [vmem:[#allocation5 + $0x6f0] sm:$0xff] }
  0x56   :  { %954 = vmatpush.bf16.msrb.mxu1 %v678_v10  ;;  %v721_v10 = vpack.c.bf16 %v325_v4, %v324_v3  ;;  %v397_v48 = vld [vmem:[#allocation5 + $0x778] sm:$0xff]  ;;  %v718_v52 = vpack.c.bf16 %v319_v40, %v318_v39  ;;  %v106_v53 = vld [vmem:[#allocation2 + $0x40] sm:$0xff]  ;;  %v108_v54 = vld [vmem:[#allocation2 + $0x50] sm:$0xff] }
  0x57   :  { %967 = vmatpush.bf16.msrb.mxu2 %v686_v14  ;;  %v307_v14 = vld [vmem:[#allocation5 + $0x4a8] sm:$0xff]  ;;  %v412_v55 = vld [vmem:[#allocation5 + $0x7f0] sm:$0xff]  ;;  %v107_v59 = vld [vmem:[#allocation2 + $0x48] sm:$0xff]  ;;  %v136_v2 = vpack.c.bf16 %v106_v53, %v106_v53  ;;  %v138_v3 = vpack.c.bf16 %v108_v54, %v108_v54 }
  0x58   :  { %980 = vmatpush.bf16.msrb.mxu3 %v694_v24  ;;  %942 = vmatmul.bf16.vlgmr.msrb.gmra.mxu0 %v132_v28  ;;  %v712_v21 = vpack.c.bf16 %v307_v14, %v306_v13  ;;  %v289_v24 = vld [vmem:[#allocation5 + $0x418] sm:$0xff]  ;;  %v109_v60 = vld [vmem:[#allocation2 + $0x58] sm:$0xff]  ;;  %v362_v63 = vld [vmem:[#allocation5 + $0x660] sm:$0xff]  ;;  %v137_v8 = vpack.c.bf16 %v107_v59, %v107_v59 }
  0x59   :  { %986 = vmatpush.bf16.msra.mxu0 %v709_v15  ;;  %955 = vmatmul.bf16.vlgmr.msrb.gmra.mxu1 %v133_v35  ;;  %v322_v15 = vld [vmem:[#allocation5 + $0x520] sm:$0xff]  ;;  %v321_v28 = vld [vmem:[#allocation5 + $0x518] sm:$0xff]  ;;  %v703_v31 = vpack.c.bf16 %v289_v24, %v288_v23  ;;  %v711_v35 = vpack.c.bf16 %v305_v26, %v304_v25  ;;  %v363_v0 = vld [vmem:[#allocation5 + $0x668] sm:$0xff] }
  0x5a   :  { %999 = vmatpush.bf16.msra.mxu1 %v717_v19  ;;  %968 = vmatmul.bf16.vlgmr.msrb.gmra.mxu2 %v134_v30  ;;  %v338_v19 = vld [vmem:[#allocation5 + $0x5a0] sm:$0xff]  ;;  %v720_v22 = vpack.c.bf16 %v323_v16, %v322_v15  ;;  %v336_v30 = vld [vmem:[#allocation5 + $0x590] sm:$0xff]  ;;  %v379_v4 = vld [vmem:[#allocation5 + $0x6e8] sm:$0xff] }
  0x5b   :  { %1012 = vmatpush.bf16.msra.mxu2 %v725_v20  ;;  %981 = vmatmul.bf16.vlgmr.msrb.gmra.mxu3 %v135_v41  ;;  %v339_v20 = vld [vmem:[#allocation5 + $0x5a8] sm:$0xff]  ;;  %v364_v41 = vld [vmem:[#allocation5 + $0x670] sm:$0xff]  ;;  %v378_v1 = vld [vmem:[#allocation5 + $0x6e0] sm:$0xff] }
  0x5c   :  { %1025 = vmatpush.bf16.msra.mxu3 %v733_v29  ;;  %v728_v29 = vpack.c.bf16 %v339_v20, %v338_v19  ;;  %v741_v56 = vpack.c.bf16 %v365_v42, %v364_v41  ;;  %v410_v11 = vld [vmem:[#allocation5 + $0x7e0] sm:$0xff]  ;;  %v411_v12 = vld [vmem:[#allocation5 + $0x7e8] sm:$0xff]  ;;  %v748_v13 = vpack.c.bf16 %v379_v4, %v378_v1  ;;  %v360_v15 = vld [vmem:[#allocation5 + $0x650] sm:$0xff] }
  0x5d   :  { %987 = vmatpush.bf16.msra.mxu0 %v708_v32  ;;  %v337_v32 = vld [vmem:[#allocation5 + $0x598] sm:$0xff]  ;;  %v392_v19 = vld [vmem:[#allocation5 + $0x750] sm:$0xff]  ;;  %v358_v25 = vld [vmem:[#allocation5 + $0x640] sm:$0xff] }
  0x5e   :  { %1000 = vmatpush.bf16.msra.mxu1 %v716_v36  ;;  %v719_v36 = vpack.c.bf16 %v321_v28, %v320_v27  ;;  %v727_v43 = vpack.c.bf16 %v337_v32, %v336_v30  ;;  %v361_v16 = vld [vmem:[#allocation5 + $0x658] sm:$0xff]  ;;  %v408_v23 = vld [vmem:[#allocation5 + $0x7d0] sm:$0xff]  ;;  %v359_v28 = vld [vmem:[#allocation5 + $0x648] sm:$0xff] }
  0x5f   :  { %1013 = vmatpush.bf16.msra.mxu2 %v724_v37  ;;  %v302_v37 = vld [vmem:[#allocation5 + $0x480] sm:$0xff]  ;;  %v393_v20 = vld [vmem:[#allocation5 + $0x758] sm:$0xff]  ;;  %v375_v30 = vld [vmem:[#allocation5 + $0x6c8] sm:$0xff]  ;;  %v738_v34 = vpack.c.bf16 %v359_v28, %v358_v25 }
  0x60   :  { %1026 = vmatpush.bf16.msra.mxu3 %v732_v45  ;;  %v381_v45 = vld [vmem:[#allocation5 + $0x6f8] sm:$0xff]  ;;  %v710_v51 = vpack.c.bf16 %v303_v38, %v302_v37  ;;  %v755_v27 = vpack.c.bf16 %v393_v20, %v392_v19  ;;  %v391_v32 = vld [vmem:[#allocation5 + $0x748] sm:$0xff]  ;;  %v356_v39 = vld [vmem:[#allocation5 + $0x630] sm:$0xff] }
  0x61   :  { %988 = vmatpush.bf16.msra.mxu0 %v707_v46  ;;  %v396_v46 = vld [vmem:[#allocation5 + $0x770] sm:$0xff]  ;;  %v409_v24 = vld [vmem:[#allocation5 + $0x7d8] sm:$0xff]  ;;  %v370_v53 = vld [vmem:[#allocation5 + $0x6a0] sm:$0xff] }
  0x62   :  { %1001 = vmatpush.bf16.msra.mxu1 %v715_v49  ;;  %v334_v49 = vld [vmem:[#allocation5 + $0x580] sm:$0xff]  ;;  %v763_v33 = vpack.c.bf16 %v409_v24, %v408_v23  ;;  %v357_v40 = vld [vmem:[#allocation5 + $0x638] sm:$0xff]  ;;  %v372_v41 = vld [vmem:[#allocation5 + $0x6b0] sm:$0xff] }
  0x63   :  { %1014 = vmatpush.bf16.msra.mxu2 %v723_v50  ;;  %v335_v50 = vld [vmem:[#allocation5 + $0x588] sm:$0xff]  ;;  %v373_v42 = vld [vmem:[#allocation5 + $0x6b8] sm:$0xff]  ;;  %v402_v59 = vld [vmem:[#allocation5 + $0x7a0] sm:$0xff] }
  0x64   :  { %1027 = vmatpush.bf16.msra.mxu3 %v731_v57  ;;  %v749_v57 = vpack.c.bf16 %v381_v45, %v380_v44  ;;  %v389_v44 = vld [vmem:[#allocation5 + $0x738] sm:$0xff]  ;;  %v371_v54 = vld [vmem:[#allocation5 + $0x6a8] sm:$0xff]  ;;  %v368_v1 = vld [vmem:[#allocation5 + $0x690] sm:$0xff] }
  0x65   :  { %989 = vmatpush.bf16.msra.mxu0 %v706_v58  ;;  %v413_v58 = vld [vmem:[#allocation5 + $0x7f8] sm:$0xff]  ;;  %v444_v20 = vld [vmem:[#allocation5 + $0x8f0] sm:$0xff]  ;;  %v398_v25 = vld [vmem:[#allocation5 + $0x780] sm:$0xff] }
  0x66   :  { %1002 = vmatpush.bf16.msra.mxu1 %v714_v61  ;;  %v757_v61 = vpack.c.bf16 %v397_v48, %v396_v46  ;;  %v765_v7 = vpack.c.bf16 %v413_v58, %v412_v55  ;;  %v737_v46 = vpack.c.bf16 %v357_v40, %v356_v39  ;;  %v405_v48 = vld [vmem:[#allocation5 + $0x7b8] sm:$0xff]  ;;  %v386_v55 = vld [vmem:[#allocation5 + $0x720] sm:$0xff]  ;;  %v427_v40 = vld [vmem:[#allocation5 + $0x868] sm:$0xff] }
  0x67   :  { %1015 = vmatpush.bf16.msra.mxu2 %v722_v62  ;;  %v726_v62 = vpack.c.bf16 %v335_v50, %v334_v49  ;;  %v745_v49 = vpack.c.bf16 %v373_v42, %v372_v41  ;;  %v385_v4 = vld [vmem:[#allocation5 + $0x718] sm:$0xff]  ;;  %v426_v39 = vld [vmem:[#allocation5 + $0x860] sm:$0xff] }
  0x68   :  { %1028 = vmatpush.bf16.msra.mxu3 %v730_v5  ;;  %v394_v5 = vld [vmem:[#allocation5 + $0x760] sm:$0xff]  ;;  %v461_v24 = vld [vmem:[#allocation5 + $0x978] sm:$0xff] }
  0x69   :  { %990 = vmatpush.bf16.msra.mxu0 %v705_v6  ;;  %v395_v6 = vld [vmem:[#allocation5 + $0x768] sm:$0xff]  ;;  %v442_v41 = vld [vmem:[#allocation5 + $0x8e0] sm:$0xff] }
  0x6a   :  { %1003 = vmatpush.bf16.msra.mxu1 %v713_v9  ;;  %v139_v9 = vpack.c.bf16 %v109_v60, %v109_v60  ;;  %v756_v14 = vpack.c.bf16 %v395_v6, %v394_v5  ;;  %v403_v60 = vld [vmem:[#allocation5 + $0x7a8] sm:$0xff]  ;;  %v400_v6 = vld [vmem:[#allocation5 + $0x790] sm:$0xff] }
  0x6b   :  { %1016 = vmatpush.bf16.msra.mxu2 %v721_v10  ;;  %v740_v10 = vpack.c.bf16 %v363_v0, %v362_v63  ;;  %v352_v63 = vld [vmem:[#allocation5 + $0x610] sm:$0xff]  ;;  %v353_v0 = vld [vmem:[#allocation5 + $0x618] sm:$0xff]  ;;  %v760_v5 = vpack.c.bf16 %v403_v60, %v402_v59 }
  0x6c   :  { %1029 = vmatpush.bf16.msra.mxu3 %v729_v17  ;;  %v376_v17 = vld [vmem:[#allocation5 + $0x6d0] sm:$0xff]  ;;  %v457_v60 = vld [vmem:[#allocation5 + $0x958] sm:$0xff] }
  0x6d   :  { %991 = vmatpush.bf16.msra.mxu0 %v704_v18  ;;  %v377_v18 = vld [vmem:[#allocation5 + $0x6d8] sm:$0xff]  ;;  %v456_v59 = vld [vmem:[#allocation5 + $0x950] sm:$0xff] }
  0x6e   :  { %1004 = vmatpush.bf16.msra.mxu1 %v712_v21  ;;  %v764_v21 = vpack.c.bf16 %v411_v12, %v410_v11  ;;  %v747_v26 = vpack.c.bf16 %v377_v18, %v376_v17  ;;  %v428_v17 = vld [vmem:[#allocation5 + $0x870] sm:$0xff]  ;;  %v429_v18 = vld [vmem:[#allocation5 + $0x878] sm:$0xff] }
  0x6f   :  { %1017 = vmatpush.bf16.msra.mxu2 %v720_v22  ;;  %v739_v22 = vpack.c.bf16 %v361_v16, %v360_v15  ;;  %v382_v15 = vld [vmem:[#allocation5 + $0x700] sm:$0xff]  ;;  %v383_v16 = vld [vmem:[#allocation5 + $0x708] sm:$0xff] }
  0x70   :  { %1030 = vmatpush.bf16.msra.mxu3 %v728_v29  ;;  %v374_v29 = vld [vmem:[#allocation5 + $0x6c0] sm:$0xff]  ;;  %v750_v28 = vpack.c.bf16 %v383_v16, %v382_v15  ;;  %v420_v15 = vld [vmem:[#allocation5 + $0x830] sm:$0xff]  ;;  %v421_v16 = vld [vmem:[#allocation5 + $0x838] sm:$0xff] }
  0x71   :  { %992 = vmatpush.bf16.msra.mxu0 %v703_v31  ;;  %v390_v31 = vld [vmem:[#allocation5 + $0x740] sm:$0xff]  ;;  %v746_v37 = vpack.c.bf16 %v375_v30, %v374_v29  ;;  %v110_v29 = vld [vmem:[#allocation2 + $0x60] sm:$0xff] }
  0x72   :  { %1005 = vmatpush.bf16.msra.mxu1 %v711_v35  ;;  %v406_v35 = vld [vmem:[#allocation5 + $0x7c0] sm:$0xff]  ;;  %v754_v38 = vpack.c.bf16 %v391_v32, %v390_v31  ;;  %v476_v31 = vld [vmem:[#allocation5 + $0x9f0] sm:$0xff]  ;;  %v773_v32 = vpack.c.bf16 %v429_v18, %v428_v17  ;;  %v140_v42 = vpack.c.bf16 %v110_v29, %v110_v29  ;;  %v437_v18 = vld [vmem:[#allocation5 + $0x8b8] sm:$0xff] }
  0x73   :  { %1018 = vmatpush.bf16.msra.mxu2 %v719_v36  ;;  %v407_v36 = vld [vmem:[#allocation5 + $0x7c8] sm:$0xff]  ;;  %v112_v30 = vld [vmem:[#allocation2 + $0x70] sm:$0xff]  ;;  %v436_v17 = vld [vmem:[#allocation5 + $0x8b0] sm:$0xff] }
  0x74   :  { %1031 = vmatpush.bf16.msra.mxu3 %v727_v43  ;;  %v388_v43 = vld [vmem:[#allocation5 + $0x730] sm:$0xff]  ;;  %v762_v45 = vpack.c.bf16 %v407_v36, %v406_v35  ;;  %v111_v35 = vld [vmem:[#allocation2 + $0x68] sm:$0xff]  ;;  %v113_v36 = vld [vmem:[#allocation2 + $0x78] sm:$0xff] }
  0x75   :  { %993 = vmatpush.bf16.msra.mxu0 %v702_v47  ;;  %v404_v47 = vld [vmem:[#allocation5 + $0x7b0] sm:$0xff]  ;;  %v753_v50 = vpack.c.bf16 %v389_v44, %v388_v43  ;;  %v142_v43 = vpack.c.bf16 %v112_v30, %v112_v30  ;;  %v443_v44 = vld [vmem:[#allocation5 + $0x8e8] sm:$0xff]  ;;  %v434_v29 = vld [vmem:[#allocation5 + $0x8a0] sm:$0xff] }
  0x76   :  { %1006 = vmatpush.bf16.msra.mxu1 %v710_v51  ;;  %v354_v51 = vld [vmem:[#allocation5 + $0x620] sm:$0xff]  ;;  %v435_v30 = vld [vmem:[#allocation5 + $0x8a8] sm:$0xff] }
  0x77   :  { %1019 = vmatpush.bf16.msra.mxu2 %v718_v52  ;;  %v355_v52 = vld [vmem:[#allocation5 + $0x628] sm:$0xff] }
  0x78   :  { %1032 = vmatpush.bf16.msra.mxu3 %v726_v62  ;;  %994 = vmatmul.bf16.vlgmr.msra.gmra.mxu0 %v136_v2  ;;  %v736_v58 = vpack.c.bf16 %v355_v52, %v354_v51  ;;  %v369_v2 = vld [vmem:[#allocation5 + $0x698] sm:$0xff]  ;;  %v474_v51 = vld [vmem:[#allocation5 + $0x9e0] sm:$0xff]  ;;  %v475_v52 = vld [vmem:[#allocation5 + $0x9e8] sm:$0xff] }
  0x79   :  { %1038 = vmatpush.bf16.msrb.mxu0 %v741_v56  ;;  %1007 = vmatmul.bf16.vlgmr.msra.gmra.mxu1 %v137_v8  ;;  %v387_v56 = vld [vmem:[#allocation5 + $0x728] sm:$0xff]  ;;  %v401_v8 = vld [vmem:[#allocation5 + $0x798] sm:$0xff]  ;;  %v743_v11 = vpack.c.bf16 %v369_v2, %v368_v1  ;;  %v787_v2 = vpack.c.bf16 %v457_v60, %v456_v59  ;;  %v508_v60 = vld [vmem:[#allocation5 + $0xaf0] sm:$0xff] }
  0x7a   :  { %1051 = vmatpush.bf16.msrb.mxu1 %v749_v57  ;;  %1020 = vmatmul.bf16.vlgmr.msra.gmra.mxu2 %v138_v3  ;;  %v761_v57 = vpack.c.bf16 %v405_v48, %v404_v47  ;;  %v752_v62 = vpack.c.bf16 %v387_v56, %v386_v55  ;;  %v384_v3 = vld [vmem:[#allocation5 + $0x710] sm:$0xff]  ;;  %v759_v19 = vpack.c.bf16 %v401_v8, %v400_v6  ;;  %v425_v56 = vld [vmem:[#allocation5 + $0x858] sm:$0xff]  ;;  %v439_v6 = vld [vmem:[#allocation5 + $0x8c8] sm:$0xff] }
  0x7b   :  { %1064 = vmatpush.bf16.msrb.mxu2 %v757_v61  ;;  %1033 = vmatmul.bf16.vlgmr.msra.gmra.mxu3 %v139_v9  ;;  %v744_v61 = vpack.c.bf16 %v371_v54, %v370_v53  ;;  %v350_v9 = vld [vmem:[#allocation5 + $0x600] sm:$0xff]  ;;  %v751_v12 = vpack.c.bf16 %v385_v4, %v384_v3  ;;  %v141_v48 = vpack.c.bf16 %v111_v35, %v111_v35  ;;  %v424_v55 = vld [vmem:[#allocation5 + $0x850] sm:$0xff]  ;;  %v423_v4 = vld [vmem:[#allocation5 + $0x848] sm:$0xff] }
  0x7c   :  { %1077 = vmatpush.bf16.msrb.mxu3 %v765_v7  ;;  %v735_v7 = vpack.c.bf16 %v353_v0, %v352_v63  ;;  %v780_v53 = vpack.c.bf16 %v443_v44, %v442_v41  ;;  %v472_v63 = vld [vmem:[#allocation5 + $0x9d0] sm:$0xff]  ;;  %v473_v0 = vld [vmem:[#allocation5 + $0x9d8] sm:$0xff]  ;;  %v422_v3 = vld [vmem:[#allocation5 + $0x840] sm:$0xff] }
  0x7d   :  { %1039 = vmatpush.bf16.msrb.mxu0 %v740_v10  ;;  %v351_v10 = vld [vmem:[#allocation5 + $0x608] sm:$0xff]  ;;  %v466_v35 = vld [vmem:[#allocation5 + $0x9a0] sm:$0xff]  ;;  %v432_v41 = vld [vmem:[#allocation5 + $0x890] sm:$0xff] }
  0x7e   :  { %1052 = vmatpush.bf16.msrb.mxu1 %v748_v13  ;;  %v366_v13 = vld [vmem:[#allocation5 + $0x680] sm:$0xff]  ;;  %v734_v23 = vpack.c.bf16 %v351_v10, %v350_v9  ;;  %v455_v8 = vld [vmem:[#allocation5 + $0x948] sm:$0xff]  ;;  %v795_v9 = vpack.c.bf16 %v473_v0, %v472_v63  ;;  %v770_v10 = vpack.c.bf16 %v423_v4, %v422_v3  ;;  %v449_v44 = vld [vmem:[#allocation5 + $0x918] sm:$0xff] }
  0x7f   :  { %1065 = vmatpush.bf16.msrb.mxu2 %v756_v14  ;;  %v367_v14 = vld [vmem:[#allocation5 + $0x688] sm:$0xff]  ;;  %v525_v0 = vld [vmem:[#allocation5 + $0xb78] sm:$0xff] }
  0x80   :  { %1078 = vmatpush.bf16.msrb.mxu3 %v764_v21  ;;  %v445_v21 = vld [vmem:[#allocation5 + $0x8f8] sm:$0xff] }
  0x81   :  { %1040 = vmatpush.bf16.msrb.mxu0 %v739_v22  ;;  %v460_v22 = vld [vmem:[#allocation5 + $0x970] sm:$0xff] }
  0x82   :  { %1053 = vmatpush.bf16.msrb.mxu1 %v747_v26  ;;  %v399_v26 = vld [vmem:[#allocation5 + $0x788] sm:$0xff] }
  0x83   :  { %1066 = vmatpush.bf16.msrb.mxu2 %v755_v27  ;;  %v742_v27 = vpack.c.bf16 %v367_v14, %v366_v13 }
  0x84   :  { %1079 = vmatpush.bf16.msrb.mxu3 %v763_v33  ;;  %v781_v33 = vpack.c.bf16 %v445_v21, %v444_v20  ;;  %v453_v20 = vld [vmem:[#allocation5 + $0x938] sm:$0xff] }
  0x85   :  { %1041 = vmatpush.bf16.msrb.mxu0 %v738_v34  ;;  %v477_v34 = vld [vmem:[#allocation5 + $0x9f8] sm:$0xff] }
  0x86   :  { %1054 = vmatpush.bf16.msrb.mxu1 %v746_v37  ;;  %v789_v37 = vpack.c.bf16 %v461_v24, %v460_v22  ;;  %v797_v47 = vpack.c.bf16 %v477_v34, %v476_v31  ;;  %v769_v22 = vpack.c.bf16 %v421_v16, %v420_v15  ;;  %v469_v24 = vld [vmem:[#allocation5 + $0x9b8] sm:$0xff]  ;;  %v450_v31 = vld [vmem:[#allocation5 + $0x920] sm:$0xff]  ;;  %v491_v16 = vld [vmem:[#allocation5 + $0xa68] sm:$0xff] }
  0x87   :  { %1067 = vmatpush.bf16.msrb.mxu2 %v754_v38  ;;  %v758_v38 = vpack.c.bf16 %v399_v26, %v398_v25  ;;  %v777_v25 = vpack.c.bf16 %v437_v18, %v436_v17  ;;  %v490_v15 = vld [vmem:[#allocation5 + $0xa60] sm:$0xff] }
  0x88   :  { %1080 = vmatpush.bf16.msrb.mxu3 %v762_v45  ;;  %v458_v45 = vld [vmem:[#allocation5 + $0x960] sm:$0xff] }
  0x89   :  { %1042 = vmatpush.bf16.msrb.mxu0 %v737_v46  ;;  %v459_v46 = vld [vmem:[#allocation5 + $0x968] sm:$0xff]  ;;  %v506_v17 = vld [vmem:[#allocation5 + $0xae0] sm:$0xff] }
  0x8a   :  { %1055 = vmatpush.bf16.msrb.mxu1 %v745_v49  ;;  %v143_v49 = vpack.c.bf16 %v113_v36, %v113_v36  ;;  %v788_v54 = vpack.c.bf16 %v459_v46, %v458_v45  ;;  %v467_v36 = vld [vmem:[#allocation5 + $0x9a8] sm:$0xff]  ;;  %v464_v46 = vld [vmem:[#allocation5 + $0x990] sm:$0xff] }
  0x8b   :  { %1068 = vmatpush.bf16.msrb.mxu2 %v753_v50  ;;  %v772_v50 = vpack.c.bf16 %v427_v40, %v426_v39  ;;  %v416_v39 = vld [vmem:[#allocation5 + $0x810] sm:$0xff]  ;;  %v417_v40 = vld [vmem:[#allocation5 + $0x818] sm:$0xff]  ;;  %v792_v45 = vpack.c.bf16 %v467_v36, %v466_v35 }
  0x8c   :  { %1081 = vmatpush.bf16.msrb.mxu3 %v761_v57  ;;  %v440_v57 = vld [vmem:[#allocation5 + $0x8d0] sm:$0xff]  ;;  %v521_v36 = vld [vmem:[#allocation5 + $0xb58] sm:$0xff] }
  0x8d   :  { %1043 = vmatpush.bf16.msrb.mxu0 %v736_v58  ;;  %v441_v58 = vld [vmem:[#allocation5 + $0x8d8] sm:$0xff]  ;;  %v520_v35 = vld [vmem:[#allocation5 + $0xb50] sm:$0xff] }
  0x8e   :  { %1056 = vmatpush.bf16.msrb.mxu1 %v744_v61  ;;  %v796_v61 = vpack.c.bf16 %v475_v52, %v474_v51  ;;  %v779_v1 = vpack.c.bf16 %v441_v58, %v440_v57  ;;  %v492_v57 = vld [vmem:[#allocation5 + $0xa70] sm:$0xff]  ;;  %v493_v58 = vld [vmem:[#allocation5 + $0xa78] sm:$0xff] }
  0x8f   :  { %1069 = vmatpush.bf16.msrb.mxu2 %v752_v62  ;;  %v771_v62 = vpack.c.bf16 %v425_v56, %v424_v55  ;;  %v446_v55 = vld [vmem:[#allocation5 + $0x900] sm:$0xff]  ;;  %v447_v56 = vld [vmem:[#allocation5 + $0x908] sm:$0xff] }
  0x90   :  { %1082 = vmatpush.bf16.msrb.mxu3 %v760_v5  ;;  %v438_v5 = vld [vmem:[#allocation5 + $0x8c0] sm:$0xff]  ;;  %v782_v4 = vpack.c.bf16 %v447_v56, %v446_v55  ;;  %v485_v56 = vld [vmem:[#allocation5 + $0xa38] sm:$0xff] }
  0x91   :  { %1044 = vmatpush.bf16.msrb.mxu0 %v735_v7  ;;  %v454_v7 = vld [vmem:[#allocation5 + $0x940] sm:$0xff]  ;;  %v778_v13 = vpack.c.bf16 %v439_v6, %v438_v5  ;;  %v114_v5 = vld [vmem:[#allocation2 + $0x80] sm:$0xff] }
  0x92   :  { %1057 = vmatpush.bf16.msrb.mxu1 %v743_v11  ;;  %v470_v11 = vld [vmem:[#allocation5 + $0x9c0] sm:$0xff]  ;;  %v786_v14 = vpack.c.bf16 %v455_v8, %v454_v7  ;;  %v540_v7 = vld [vmem:[#allocation5 + $0xbf0] sm:$0xff]  ;;  %v805_v8 = vpack.c.bf16 %v493_v58, %v492_v57  ;;  %v144_v18 = vpack.c.bf16 %v114_v5, %v114_v5  ;;  %v501_v58 = vld [vmem:[#allocation5 + $0xab8] sm:$0xff] }
  0x93   :  { %1070 = vmatpush.bf16.msrb.mxu2 %v751_v12  ;;  %v471_v12 = vld [vmem:[#allocation5 + $0x9c8] sm:$0xff]  ;;  %v116_v6 = vld [vmem:[#allocation2 + $0x90] sm:$0xff]  ;;  %v500_v57 = vld [vmem:[#allocation5 + $0xab0] sm:$0xff] }
  0x94   :  { %1083 = vmatpush.bf16.msrb.mxu3 %v759_v19  ;;  %v452_v19 = vld [vmem:[#allocation5 + $0x930] sm:$0xff]  ;;  %v794_v21 = vpack.c.bf16 %v471_v12, %v470_v11  ;;  %v115_v11 = vld [vmem:[#allocation2 + $0x88] sm:$0xff]  ;;  %v117_v12 = vld [vmem:[#allocation2 + $0x98] sm:$0xff] }
  0x95   :  { %1045 = vmatpush.bf16.msrb.mxu0 %v734_v23  ;;  %v468_v23 = vld [vmem:[#allocation5 + $0x9b0] sm:$0xff]  ;;  %v785_v26 = vpack.c.bf16 %v453_v20, %v452_v19  ;;  %v146_v19 = vpack.c.bf16 %v116_v6, %v116_v6  ;;  %v507_v20 = vld [vmem:[#allocation5 + $0xae8] sm:$0xff]  ;;  %v498_v6 = vld [vmem:[#allocation5 + $0xaa0] sm:$0xff] }
  0x96   :  { %1058 = vmatpush.bf16.msrb.mxu1 %v742_v27  ;;  %v418_v27 = vld [vmem:[#allocation5 + $0x820] sm:$0xff]  ;;  %v483_v5 = vld [vmem:[#allocation5 + $0xa28] sm:$0xff] }
  0x97   :  { %1071 = vmatpush.bf16.msrb.mxu2 %v750_v28  ;;  %v419_v28 = vld [vmem:[#allocation5 + $0x828] sm:$0xff] }
  0x98   :  { %1084 = vmatpush.bf16.msrb.mxu3 %v758_v38  ;;  %1046 = vmatmul.bf16.vlgmr.msrb.gmra.mxu0 %v140_v42  ;;  %v768_v34 = vpack.c.bf16 %v419_v28, %v418_v27  ;;  %v433_v42 = vld [vmem:[#allocation5 + $0x898] sm:$0xff]  ;;  %v538_v27 = vld [vmem:[#allocation5 + $0xbe0] sm:$0xff]  ;;  %v539_v28 = vld [vmem:[#allocation5 + $0xbe8] sm:$0xff] }
  0x99   :  { %1090 = vmatpush.bf16.msra.mxu0 %v773_v32  ;;  %1059 = vmatmul.bf16.vlgmr.msrb.gmra.mxu1 %v141_v48  ;;  %v451_v32 = vld [vmem:[#allocation5 + $0x928] sm:$0xff]  ;;  %v465_v48 = vld [vmem:[#allocation5 + $0x998] sm:$0xff]  ;;  %v775_v51 = vpack.c.bf16 %v433_v42, %v432_v41  ;;  %v819_v42 = vpack.c.bf16 %v521_v36, %v520_v35 }
  0x9a   :  { %1103 = vmatpush.bf16.msra.mxu1 %v781_v33  ;;  %1072 = vmatmul.bf16.vlgmr.msrb.gmra.mxu2 %v142_v43  ;;  %v793_v33 = vpack.c.bf16 %v469_v24, %v468_v23  ;;  %v784_v38 = vpack.c.bf16 %v451_v32, %v450_v31  ;;  %v448_v43 = vld [vmem:[#allocation5 + $0x910] sm:$0xff]  ;;  %v791_v59 = vpack.c.bf16 %v465_v48, %v464_v46  ;;  %v489_v32 = vld [vmem:[#allocation5 + $0xa58] sm:$0xff]  ;;  %v503_v46 = vld [vmem:[#allocation5 + $0xac8] sm:$0xff] }
  0x9b   :  { %1116 = vmatpush.bf16.msra.mxu2 %v789_v37  ;;  %1085 = vmatmul.bf16.vlgmr.msrb.gmra.mxu3 %v143_v49  ;;  %v776_v37 = vpack.c.bf16 %v435_v30, %v434_v29  ;;  %v414_v49 = vld [vmem:[#allocation5 + $0x800] sm:$0xff]  ;;  %v783_v52 = vpack.c.bf16 %v449_v44, %v448_v43  ;;  %v145_v24 = vpack.c.bf16 %v115_v11, %v115_v11  ;;  %v488_v31 = vld [vmem:[#allocation5 + $0xa50] sm:$0xff]  ;;  %v487_v44 = vld [vmem:[#allocation5 + $0xa48] sm:$0xff] }
  0x9c   :  { %1129 = vmatpush.bf16.msra.mxu3 %v797_v47  ;;  %v767_v47 = vpack.c.bf16 %v417_v40, %v416_v39  ;;  %v812_v29 = vpack.c.bf16 %v507_v20, %v506_v17  ;;  %v536_v39 = vld [vmem:[#allocation5 + $0xbd0] sm:$0xff]  ;;  %v537_v40 = vld [vmem:[#allocation5 + $0xbd8] sm:$0xff]  ;;  %v486_v43 = vld [vmem:[#allocation5 + $0xa40] sm:$0xff] }
  0x9d   :  { %1091 = vmatpush.bf16.msra.mxu0 %v772_v50  ;;  %v415_v50 = vld [vmem:[#allocation5 + $0x808] sm:$0xff]  ;;  %v480_v20 = vld [vmem:[#allocation5 + $0xa10] sm:$0xff] }
  0x9e   :  { %1104 = vmatpush.bf16.msra.mxu1 %v780_v53  ;;  %v430_v53 = vld [vmem:[#allocation5 + $0x880] sm:$0xff]  ;;  %v766_v63 = vpack.c.bf16 %v415_v50, %v414_v49  ;;  %v519_v48 = vld [vmem:[#allocation5 + $0xb48] sm:$0xff]  ;;  %v827_v49 = vpack.c.bf16 %v537_v40, %v536_v39  ;;  %v802_v50 = vpack.c.bf16 %v487_v44, %v486_v43  ;;  %v556_v43 = vld [vmem:[#allocation5 + $0xc70] sm:$0xff] }
  0x9f   :  { %1117 = vmatpush.bf16.msra.mxu2 %v788_v54  ;;  %v431_v54 = vld [vmem:[#allocation5 + $0x888] sm:$0xff]  ;;  %v510_v39 = vld [vmem:[#allocation5 + $0xb00] sm:$0xff]  ;;  %v557_v44 = vld [vmem:[#allocation5 + $0xc78] sm:$0xff] }
  0xa0   :  { %1130 = vmatpush.bf16.msra.mxu3 %v796_v61  ;;  %v509_v61 = vld [vmem:[#allocation5 + $0xaf8] sm:$0xff]  ;;  %v774_v3 = vpack.c.bf16 %v431_v54, %v430_v53  ;;  %v484_v53 = vld [vmem:[#allocation5 + $0xa30] sm:$0xff] }
  0xa1   :  { %1092 = vmatpush.bf16.msra.mxu0 %v771_v62  ;;  %v524_v62 = vld [vmem:[#allocation5 + $0xb70] sm:$0xff] }
  0xa2   :  { %1105 = vmatpush.bf16.msra.mxu1 %v779_v1  ;;  %v462_v1 = vld [vmem:[#allocation5 + $0x980] sm:$0xff] }
  0xa3   :  { %1118 = vmatpush.bf16.msra.mxu2 %v787_v2  ;;  %v463_v2 = vld [vmem:[#allocation5 + $0x988] sm:$0xff] }
  0xa4   :  { %1131 = vmatpush.bf16.msra.mxu3 %v795_v9  ;;  %v813_v9 = vpack.c.bf16 %v509_v61, %v508_v60  ;;  %v517_v60 = vld [vmem:[#allocation5 + $0xb38] sm:$0xff]  ;;  %v1400_v61 = vld [vmem:[#allocation7] ss:$0 sm:$0xff] }
  0xa5   :  { %1093 = vmatpush.bf16.msra.mxu0 %v770_v10  ;;  %v541_v10 = vld [vmem:[#allocation5 + $0xbf8] sm:$0xff] }
  0xa6   :  { %1106 = vmatpush.bf16.msra.mxu1 %v778_v13  ;;  %v821_v13 = vpack.c.bf16 %v525_v0, %v524_v62  ;;  %v829_v23 = vpack.c.bf16 %v541_v10, %v540_v7  ;;  %v532_v0 = vld [vmem:[#allocation5 + $0xbb0] sm:$0xff]  ;;  %v515_v10 = vld [vmem:[#allocation5 + $0xb28] sm:$0xff] }
  0xa7   :  { %1119 = vmatpush.bf16.msra.mxu2 %v786_v14  ;;  %v790_v14 = vpack.c.bf16 %v463_v2, %v462_v1  ;;  %v533_v1 = vld [vmem:[#allocation5 + $0xbb8] sm:$0xff]  ;;  %v809_v2 = vpack.c.bf16 %v501_v58, %v500_v57  ;;  %v120_v57 = vld [vmem:[#allocation2 + $0xb0] sm:$0xff]  ;;  %v604_v58 = vld [vmem:[#allocation5 + $0xdf0] sm:$0xff] }
  0xa8   :  { %1132 = vmatpush.bf16.msra.mxu3 %v794_v21  ;;  %v522_v21 = vld [vmem:[#allocation5 + $0xb60] sm:$0xff] }
  0xa9   :  { %1094 = vmatpush.bf16.msra.mxu0 %v769_v22  ;;  %v523_v22 = vld [vmem:[#allocation5 + $0xb68] sm:$0xff] }
  0xaa   :  { %1107 = vmatpush.bf16.msra.mxu1 %v777_v25  ;;  %v147_v25 = vpack.c.bf16 %v117_v12, %v117_v12  ;;  %v820_v30 = vpack.c.bf16 %v523_v22, %v522_v21  ;;  %v825_v12 = vpack.c.bf16 %v533_v1, %v532_v0  ;;  %v481_v21 = vld [vmem:[#allocation5 + $0xa18] sm:$0xff]  ;;  %v496_v22 = vld [vmem:[#allocation5 + $0xa90] sm:$0xff] }
  0xab   :  { %1120 = vmatpush.bf16.msra.mxu2 %v785_v26  ;;  %v804_v26 = vpack.c.bf16 %v491_v16, %v490_v15  ;;  %v530_v15 = vld [vmem:[#allocation5 + $0xba0] sm:$0xff]  ;;  %v531_v16 = vld [vmem:[#allocation5 + $0xba8] sm:$0xff] }
  0xac   :  { %1133 = vmatpush.bf16.msra.mxu3 %v793_v33  ;;  %v504_v33 = vld [vmem:[#allocation5 + $0xad0] sm:$0xff] }
  0xad   :  { %1095 = vmatpush.bf16.msra.mxu0 %v768_v34  ;;  %v505_v34 = vld [vmem:[#allocation5 + $0xad8] sm:$0xff] }
  0xae   :  { %1108 = vmatpush.bf16.msra.mxu1 %v776_v37  ;;  %v828_v37 = vpack.c.bf16 %v539_v28, %v538_v27  ;;  %v811_v41 = vpack.c.bf16 %v505_v34, %v504_v33  ;;  %v824_v27 = vpack.c.bf16 %v531_v16, %v530_v15  ;;  %v528_v28 = vld [vmem:[#allocation5 + $0xb90] sm:$0xff]  ;;  %v478_v33 = vld [vmem:[#allocation5 + $0xa00] sm:$0xff]  ;;  %v479_v34 = vld [vmem:[#allocation5 + $0xa08] sm:$0xff] }
  0xaf   :  { %1121 = vmatpush.bf16.msra.mxu2 %v784_v38  ;;  %v803_v38 = vpack.c.bf16 %v489_v32, %v488_v31  ;;  %v799_v31 = vpack.c.bf16 %v481_v21, %v480_v20  ;;  %v529_v32 = vld [vmem:[#allocation5 + $0xb98] sm:$0xff]  ;;  %v602_v16 = vld [vmem:[#allocation5 + $0xde0] sm:$0xff]  ;;  %v552_v20 = vld [vmem:[#allocation5 + $0xc50] sm:$0xff] }
  0xb0   :  { %1134 = vmatpush.bf16.msra.mxu3 %v792_v45  ;;  %v502_v45 = vld [vmem:[#allocation5 + $0xac0] sm:$0xff]  ;;  %v553_v21 = vld [vmem:[#allocation5 + $0xc58] sm:$0xff] }
  0xb1   :  { %1096 = vmatpush.bf16.msra.mxu0 %v767_v47  ;;  %v518_v47 = vld [vmem:[#allocation5 + $0xb40] sm:$0xff]  ;;  %v810_v54 = vpack.c.bf16 %v503_v46, %v502_v45  ;;  %v823_v45 = vpack.c.bf16 %v529_v32, %v528_v28  ;;  %v572_v46 = vld [vmem:[#allocation5 + $0xcf0] sm:$0xff] }
  0xb2   :  { %1109 = vmatpush.bf16.msra.mxu1 %v775_v51  ;;  %v534_v51 = vld [vmem:[#allocation5 + $0xbc0] sm:$0xff]  ;;  %v818_v55 = vpack.c.bf16 %v519_v48, %v518_v47  ;;  %v573_v47 = vld [vmem:[#allocation5 + $0xcf8] sm:$0xff]  ;;  %v588_v48 = vld [vmem:[#allocation5 + $0xd70] sm:$0xff] }
  0xb3   :  { %1122 = vmatpush.bf16.msra.mxu2 %v783_v52  ;;  %v535_v52 = vld [vmem:[#allocation5 + $0xbc8] sm:$0xff]  ;;  %v600_v28 = vld [vmem:[#allocation5 + $0xdd0] sm:$0xff]  ;;  %v550_v32 = vld [vmem:[#allocation5 + $0xc40] sm:$0xff] }
  0xb4   :  { %1135 = vmatpush.bf16.msra.mxu3 %v791_v59  ;;  %v516_v59 = vld [vmem:[#allocation5 + $0xb30] sm:$0xff]  ;;  %v826_v62 = vpack.c.bf16 %v535_v52, %v534_v51  ;;  %v589_v51 = vld [vmem:[#allocation5 + $0xd78] sm:$0xff]  ;;  %v526_v52 = vld [vmem:[#allocation5 + $0xb80] sm:$0xff] }
  0xb5   :  { %1097 = vmatpush.bf16.msra.mxu0 %v766_v63  ;;  %v801_v63 = vpack.c.bf16 %v485_v56, %v484_v53  ;;  %v891_v7 = vpop.f32.mrf.mxu0  ;;  %v527_v53 = vld [vmem:[#allocation5 + $0xb88] sm:$0xff]  ;;  %v118_v56 = vld [vmem:[#allocation2 + $0xa0] sm:$0xff]  ;;  %v853_v1 = vpack.c.bf16 %v589_v51, %v588_v48  ;;  %v549_v48 = vld [vmem:[#allocation5 + $0xc38] sm:$0xff] }
  0xb6   :  { %1110 = vmatpush.bf16.msra.mxu1 %v774_v3  ;;  %v817_v3 = vpack.c.bf16 %v517_v60, %v516_v59  ;;  %v892_v11 = vadd.f32 %v1400_v61, %v891_v7  ;;  %v837_v59 = vpack.c.bf16 %v557_v44, %v556_v43  ;;  %v845_v60 = vpack.c.bf16 %v573_v47, %v572_v46  ;;  %v605_v61 = vld [vmem:[#allocation5 + $0xdf8] sm:$0xff]  ;;  %v599_v43 = vld [vmem:[#allocation5 + $0xdc8] sm:$0xff]  ;;  %v548_v47 = vld [vmem:[#allocation5 + $0xc30] sm:$0xff] }
  0xb7   :  { %1123 = vmatpush.bf16.msra.mxu2 %v782_v4  ;;  %v482_v4 = vld [vmem:[#allocation5 + $0xa20] sm:$0xff]  ;;  %v148_v7 = vpack.c.bf16 %v118_v56, %v118_v56  ;;  %v565_v51 = vld [vmem:[#allocation5 + $0xcb8] sm:$0xff]  ;;  %v833_v56 = vpack.c.bf16 %v549_v48, %v548_v47 }
  0xb8   :  { %1136 = vmatpush.bf16.msra.mxu3 %v790_v14  ;;  %1098 = vmatmul.bf16.vlgmr.msra.gmra.mxu0 %v144_v18  ;;  %v800_v14 = vpack.c.bf16 %v483_v5, %v482_v4  ;;  %v555_v4 = vld [vmem:[#allocation5 + $0xc68] sm:$0xff]  ;;  %v570_v5 = vld [vmem:[#allocation5 + $0xce0] sm:$0xff] }
  0xb9   :  { %1142 = vmatpush.bf16.msrb.mxu0 %v805_v8  ;;  %1111 = vmatmul.bf16.vlgmr.msra.gmra.mxu1 %v145_v24  ;;  %v499_v8 = vld [vmem:[#allocation5 + $0xaa8] sm:$0xff]  ;;  %v512_v24 = vld [vmem:[#allocation5 + $0xb10] sm:$0xff] }
  0xba   :  { %1155 = vmatpush.bf16.msrb.mxu1 %v813_v9  ;;  %1124 = vmatmul.bf16.vlgmr.msra.gmra.mxu2 %v146_v19  ;;  %v514_v9 = vld [vmem:[#allocation5 + $0xb20] sm:$0xff]  ;;  %v808_v18 = vpack.c.bf16 %v499_v8, %v498_v6  ;;  %v150_v8 = vpack.c.bf16 %v120_v57, %v120_v57  ;;  %v596_v57 = vld [vmem:[#allocation5 + $0xdb0] sm:$0xff] }
  0xbb   :  { %1168 = vmatpush.bf16.msrb.mxu2 %v821_v13  ;;  %1137 = vmatmul.bf16.vlgmr.msra.gmra.mxu3 %v147_v25  ;;  %v904_v13 = vpop.f32.mrf.mxu1  ;;  %v816_v19 = vpack.c.bf16 %v515_v10, %v514_v9  ;;  %v513_v25 = vld [vmem:[#allocation5 + $0xb18] sm:$0xff]  ;;  %v571_v9 = vld [vmem:[#allocation5 + $0xce8] sm:$0xff]  ;;  %v586_v10 = vld [vmem:[#allocation5 + $0xd60] sm:$0xff] }
  0xbc   :  { %1181 = vmatpush.bf16.msrb.mxu3 %v829_v23  ;;  %v905_v17 = vadd.f32 %v904_v13, %v892_v11  ;;  %v497_v23 = vld [vmem:[#allocation5 + $0xa98] sm:$0xff]  ;;  %v815_v36 = vpack.c.bf16 %v513_v25, %v512_v24  ;;  %v587_v11 = vld [vmem:[#allocation5 + $0xd68] sm:$0xff]  ;;  %v584_v24 = vld [vmem:[#allocation5 + $0xd50] sm:$0xff] }
  0xbd   :  { %1143 = vmatpush.bf16.msrb.mxu0 %v804_v26  ;;  %v917_v26 = vpop.f32.mrf.mxu2  ;;  %v807_v35 = vpack.c.bf16 %v497_v23, %v496_v22  ;;  %v568_v22 = vld [vmem:[#allocation5 + $0xcd0] sm:$0xff]  ;;  %v569_v23 = vld [vmem:[#allocation5 + $0xcd8] sm:$0xff] }
  0xbe   :  { %1156 = vmatpush.bf16.msrb.mxu1 %v812_v29  ;;  %v918_v29 = vadd.f32 %v917_v26, %v905_v17  ;;  %v603_v17 = vld [vmem:[#allocation5 + $0xde8] sm:$0xff]  ;;  %v585_v25 = vld [vmem:[#allocation5 + $0xd58] sm:$0xff] }
  0xbf   :  { %1169 = vmatpush.bf16.msrb.mxu2 %v820_v30  ;;  %v930_v30 = vpop.f32.mrf.mxu3  ;;  %v860_v26 = vpack.c.bf16 %v603_v17, %v602_v16  ;;  %v561_v17 = vld [vmem:[#allocation5 + $0xc98] sm:$0xff] }
  0xc0   :  { %1182 = vmatpush.bf16.msrb.mxu3 %v828_v37  ;;  %v494_v37 = vld [vmem:[#allocation5 + $0xa80] sm:$0xff]  ;;  %v1622_v40 = vadd.f32 %v930_v30, %v918_v29  ;;  %v601_v29 = vld [vmem:[#allocation5 + $0xdd8] sm:$0xff]  ;;  %v843_v30 = vpack.c.bf16 %v569_v23, %v568_v22  ;;  %v592_v22 = vld [vmem:[#allocation5 + $0xd90] sm:$0xff] }
  0xc1   :  { %1144 = vmatpush.bf16.msrb.mxu0 %v803_v38  ;;  %v495_v38 = vld [vmem:[#allocation5 + $0xa88] sm:$0xff]  ;;  %v593_v23 = vld [vmem:[#allocation5 + $0xd98] sm:$0xff] }
  0xc2   :  { %1157 = vmatpush.bf16.msrb.mxu1 %v811_v41  ;;  %v893_v41 = vpop.f32.mrf.mxu0 }
  0xc3   :  { %1170 = vmatpush.bf16.msrb.mxu2 %v819_v42  ;;  %v511_v42 = vld [vmem:[#allocation5 + $0xb08] sm:$0xff] }
  0xc4   :  { %1183 = vmatpush.bf16.msrb.mxu3 %v827_v49  ;;  %v906_v49 = vpop.f32.mrf.mxu1 }
  0xc5   :  { %1145 = vmatpush.bf16.msrb.mxu0 %v802_v50  ;;  %v798_v50 = vpack.c.bf16 %v479_v34, %v478_v33  ;;  %v919_v0 = vpop.f32.mrf.mxu2  ;;  %v551_v33 = vld [vmem:[#allocation5 + $0xc48] sm:$0xff]  ;;  %v566_v34 = vld [vmem:[#allocation5 + $0xcc0] sm:$0xff]  ;;  %v564_v49 = vld [vmem:[#allocation5 + $0xcb0] sm:$0xff] }
  0xc6   :  { %1158 = vmatpush.bf16.msrb.mxu1 %v810_v54  ;;  %v806_v54 = vpack.c.bf16 %v495_v38, %v494_v37  ;;  %v583_v37 = vld [vmem:[#allocation5 + $0xd48] sm:$0xff]  ;;  %v859_v38 = vpack.c.bf16 %v601_v29, %v600_v28  ;;  %v834_v41 = vpack.c.bf16 %v551_v33, %v550_v32  ;;  %v578_v0 = vld [vmem:[#allocation5 + $0xd20] sm:$0xff]  ;;  %v620_v32 = vld [vmem:[#allocation5 + $0xe70] sm:$0xff] }
  0xc7   :  { %1171 = vmatpush.bf16.msrb.mxu2 %v818_v55  ;;  %v814_v55 = vpack.c.bf16 %v511_v42, %v510_v39  ;;  %v932_v6 = vpop.f32.mrf.mxu3  ;;  %v598_v42 = vld [vmem:[#allocation5 + $0xdc0] sm:$0xff]  ;;  %v559_v29 = vld [vmem:[#allocation5 + $0xc88] sm:$0xff] }
  0xc8   :  { %1184 = vmatpush.bf16.msrb.mxu3 %v826_v62  ;;  %v119_v62 = vld [vmem:[#allocation2 + $0xa8] sm:$0xff]  ;;  %v558_v28 = vld [vmem:[#allocation5 + $0xc80] sm:$0xff] }
  0xc9   :  { %1146 = vmatpush.bf16.msrb.mxu0 %v801_v63  ;;  %v121_v63 = vld [vmem:[#allocation2 + $0xb8] sm:$0xff]  ;;  %v149_v13 = vpack.c.bf16 %v119_v62, %v119_v62  ;;  %v562_v62 = vld [vmem:[#allocation5 + $0xca0] sm:$0xff] }
  0xca   :  { %1159 = vmatpush.bf16.msrb.mxu1 %v809_v2  ;;  %v822_v2 = vpack.c.bf16 %v527_v53, %v526_v52  ;;  %v580_v52 = vld [vmem:[#allocation5 + $0xd30] sm:$0xff]  ;;  %v581_v53 = vld [vmem:[#allocation5 + $0xd38] sm:$0xff] }
  0xcb   :  { %1172 = vmatpush.bf16.msrb.mxu2 %v817_v3  ;;  %v554_v3 = vld [vmem:[#allocation5 + $0xc60] sm:$0xff] }
  0xcc   :  { %1185 = vmatpush.bf16.msrb.mxu3 %v825_v12  ;;  %v861_v12 = vpack.c.bf16 %v605_v61, %v604_v58  ;;  %v836_v15 = vpack.c.bf16 %v555_v4, %v554_v3  ;;  %v597_v58 = vld [vmem:[#allocation5 + $0xdb8] sm:$0xff]  ;;  %v547_v61 = vld [vmem:[#allocation5 + $0xc28] sm:$0xff] }
  0xcd   :  { %1147 = vmatpush.bf16.msrb.mxu0 %v800_v14  ;;  %v151_v14 = vpack.c.bf16 %v121_v63, %v121_v63  ;;  %v563_v63 = vld [vmem:[#allocation5 + $0xca8] sm:$0xff]  ;;  %v857_v3 = vpack.c.bf16 %v597_v58, %v596_v57  ;;  %v634_v57 = vld [vmem:[#allocation5 + $0xee0] sm:$0xff] }
  0xce   :  { %1160 = vmatpush.bf16.msrb.mxu1 %v808_v18  ;;  %v844_v18 = vpack.c.bf16 %v571_v9, %v570_v5  ;;  %v840_v9 = vpack.c.bf16 %v563_v63, %v562_v62  ;;  %v635_v58 = vld [vmem:[#allocation5 + $0xee8] sm:$0xff]  ;;  %v617_v62 = vld [vmem:[#allocation5 + $0xe58] sm:$0xff]  ;;  %v632_v63 = vld [vmem:[#allocation5 + $0xed0] sm:$0xff] }
  0xcf   :  { %1173 = vmatpush.bf16.msrb.mxu2 %v816_v19  ;;  %v852_v19 = vpack.c.bf16 %v587_v11, %v586_v10 }
  0xd0   :  { %1186 = vmatpush.bf16.msrb.mxu3 %v824_v27  ;;  %v835_v27 = vpack.c.bf16 %v553_v21, %v552_v20 }
  0xd1   :  { %1148 = vmatpush.bf16.msrb.mxu0 %v799_v31  ;;  %v851_v31 = vpack.c.bf16 %v585_v25, %v584_v24  ;;  %v542_v24 = vld [vmem:[#allocation5 + $0xc00] sm:$0xff] }
  0xd2   :  { %1161 = vmatpush.bf16.msrb.mxu1 %v807_v35  ;;  %v567_v35 = vld [vmem:[#allocation5 + $0xcc8] sm:$0xff] }
  0xd3   :  { %1174 = vmatpush.bf16.msrb.mxu2 %v815_v36  ;;  %v582_v36 = vld [vmem:[#allocation5 + $0xd40] sm:$0xff] }
  0xd4   :  { %1187 = vmatpush.bf16.msrb.mxu3 %v823_v45  ;;  %v842_v45 = vpack.c.bf16 %v567_v35, %v566_v34  ;;  %v850_v46 = vpack.c.bf16 %v583_v37, %v582_v36  ;;  %v855_v34 = vpack.c.bf16 %v593_v23, %v592_v22  ;;  %v621_v35 = vld [vmem:[#allocation5 + $0xe78] sm:$0xff]  ;;  %v636_v36 = vld [vmem:[#allocation5 + $0xef0] sm:$0xff]  ;;  %v611_v22 = vld [vmem:[#allocation5 + $0xe28] sm:$0xff] }
  0xd5   :  { %1149 = vmatpush.bf16.msrb.mxu0 %v798_v50  ;;  %v943_v39 = vpop.f32.mrf.mxu0  ;;  %v637_v37 = vld [vmem:[#allocation5 + $0xef8] sm:$0xff]  ;;  %v869_v48 = vpack.c.bf16 %v621_v35, %v620_v32 }
  0xd6   :  { %1162 = vmatpush.bf16.msrb.mxu1 %v806_v54  ;;  %v944_v44 = vadd.f32 %v943_v39, %v1622_v40  ;;  %v956_v50 = vpop.f32.mrf.mxu1  ;;  %v841_v40 = vpack.c.bf16 %v565_v51, %v564_v49  ;;  %v590_v39 = vld [vmem:[#allocation5 + $0xd80] sm:$0xff]  ;;  %v877_v49 = vpack.c.bf16 %v637_v37, %v636_v36  ;;  %v609_v32 = vld [vmem:[#allocation5 + $0xe18] sm:$0xff] }
  0xd7   :  { %1175 = vmatpush.bf16.msrb.mxu2 %v814_v55  ;;  %v858_v55 = vpack.c.bf16 %v599_v43, %v598_v42  ;;  %v122_v42 = vld [vmem:[#allocation2 + $0xc0] sm:$0xff]  ;;  %v838_v43 = vpack.c.bf16 %v559_v29, %v558_v28  ;;  %v606_v37 = vld [vmem:[#allocation5 + $0xe00] sm:$0xff] }
  0xd8   :  { %1188 = vmatpush.bf16.msrb.mxu3 %v822_v2  ;;  %1150 = vmatmul.bf16.vlgmr.msrb.gmra.mxu0 %v148_v7  ;;  %v957_v54 = vadd.f32 %v956_v50, %v944_v44  ;;  %v594_v7 = vld [vmem:[#allocation5 + $0xda0] sm:$0xff]  ;;  %v152_v51 = vpack.c.bf16 %v122_v42, %v122_v42  ;;  %v623_v42 = vld [vmem:[#allocation5 + $0xe88] sm:$0xff] }
  0xd9   :  { %1194 = vmatpush.bf16.msra.mxu0 %v837_v59  ;;  %1163 = vmatmul.bf16.vlgmr.msrb.gmra.mxu1 %v149_v13  ;;  %v849_v59 = vpack.c.bf16 %v581_v53, %v580_v52  ;;  %v545_v13 = vld [vmem:[#allocation5 + $0xc18] sm:$0xff]  ;;  %v125_v52 = vld [vmem:[#allocation2 + $0xd8] sm:$0xff]  ;;  %v618_v53 = vld [vmem:[#allocation5 + $0xe60] sm:$0xff] }
  0xda   :  { %1207 = vmatpush.bf16.msra.mxu1 %v845_v60  ;;  %1176 = vmatmul.bf16.vlgmr.msrb.gmra.mxu2 %v150_v8  ;;  %v546_v60 = vld [vmem:[#allocation5 + $0xc20] sm:$0xff]  ;;  %v595_v8 = vld [vmem:[#allocation5 + $0xda8] sm:$0xff] }
  0xdb   :  { %1220 = vmatpush.bf16.msra.mxu2 %v853_v1  ;;  %1189 = vmatmul.bf16.vlgmr.msrb.gmra.mxu3 %v151_v14  ;;  %v579_v1 = vld [vmem:[#allocation5 + $0xd28] sm:$0xff]  ;;  %v832_v6 = vpack.c.bf16 %v547_v61, %v546_v60  ;;  %v560_v14 = vld [vmem:[#allocation5 + $0xc90] sm:$0xff]  ;;  %v856_v20 = vpack.c.bf16 %v595_v8, %v594_v7  ;;  %v876_v60 = vpack.c.bf16 %v635_v58, %v634_v57 }
  0xdc   :  { %1233 = vmatpush.bf16.msra.mxu3 %v861_v12  ;;  %v848_v10 = vpack.c.bf16 %v579_v1, %v578_v0  ;;  %v544_v12 = vld [vmem:[#allocation5 + $0xc10] sm:$0xff]  ;;  %v839_v25 = vpack.c.bf16 %v561_v17, %v560_v14  ;;  %v633_v0 = vld [vmem:[#allocation5 + $0xed8] sm:$0xff] }
  0xdd   :  { %1195 = vmatpush.bf16.msra.mxu0 %v836_v15  ;;  %v969_v2 = vpop.f32.mrf.mxu2  ;;  %v945_v5 = vpop.f32.mrf.mxu0  ;;  %v831_v21 = vpack.c.bf16 %v545_v13, %v544_v12  ;;  %v616_v61 = vld [vmem:[#allocation5 + $0xe50] sm:$0xff]  ;;  %v613_v13 = vld [vmem:[#allocation5 + $0xe38] sm:$0xff] }
  0xde   :  { %1208 = vmatpush.bf16.msra.mxu1 %v844_v18  ;;  %v970_v4 = vadd.f32 %v969_v2, %v957_v54  ;;  %v982_v11 = vpop.f32.mrf.mxu3  ;;  %v958_v15 = vpop.f32.mrf.mxu1  ;;  %v576_v18 = vld [vmem:[#allocation5 + $0xd10] sm:$0xff]  ;;  %v619_v54 = vld [vmem:[#allocation5 + $0xe68] sm:$0xff]  ;;  %v867_v1 = vpack.c.bf16 %v617_v62, %v616_v61  ;;  %v875_v2 = vpack.c.bf16 %v633_v0, %v632_v63  ;;  %v630_v5 = vld [vmem:[#allocation5 + $0xec0] sm:$0xff] }
  0xdf   :  { %1221 = vmatpush.bf16.msra.mxu2 %v852_v19  ;;  %v577_v19 = vld [vmem:[#allocation5 + $0xd18] sm:$0xff]  ;;  %v612_v12 = vld [vmem:[#allocation5 + $0xe30] sm:$0xff] }
  0xe0   :  { %1234 = vmatpush.bf16.msra.mxu3 %v860_v26  ;;  %v1625_v16 = vadd.f32 %v982_v11, %v970_v4  ;;  %v847_v26 = vpack.c.bf16 %v577_v19, %v576_v18  ;;  %v615_v4 = vld [vmem:[#allocation5 + $0xe48] sm:$0xff]  ;;  %v628_v15 = vld [vmem:[#allocation5 + $0xeb0] sm:$0xff]  ;;  %v629_v17 = vld [vmem:[#allocation5 + $0xeb8] sm:$0xff]  ;;  %v865_v18 = vpack.c.bf16 %v613_v13, %v612_v12 }
  0xe1   :  { %1196 = vmatpush.bf16.msra.mxu0 %v835_v27  ;;  %v543_v27 = vld [vmem:[#allocation5 + $0xc08] sm:$0xff]  ;;  %v873_v19 = vpack.c.bf16 %v629_v17, %v628_v15  ;;  %v1286_v13 = vld [vmem:[%s1706_s3 + $0x60] sm:$0xff]  ;;  %v1284_v15 = vld [vmem:[%s1706_s3 + $0x50] sm:$0xff] }
  0xe2   :  { %1209 = vmatpush.bf16.msra.mxu1 %v843_v30  ;;  %v574_v30 = vld [vmem:[#allocation5 + $0xd00] sm:$0xff] }
  0xe3   :  { %1222 = vmatpush.bf16.msra.mxu2 %v851_v31  ;;  %v575_v31 = vld [vmem:[#allocation5 + $0xd08] sm:$0xff] }
  0xe4   :  { %1235 = vmatpush.bf16.msra.mxu3 %v859_v38  ;;  %v830_v38 = vpack.c.bf16 %v543_v27, %v542_v24  ;;  %v846_v44 = vpack.c.bf16 %v575_v31, %v574_v30  ;;  %v626_v24 = vld [vmem:[#allocation5 + $0xea0] sm:$0xff]  ;;  %v608_v31 = vld [vmem:[#allocation5 + $0xe10] sm:$0xff] }
  0xe5   :  { %1197 = vmatpush.bf16.msra.mxu0 %v834_v41  ;;  %v971_v33 = vpop.f32.mrf.mxu2  ;;  %v591_v41 = vld [vmem:[#allocation5 + $0xd88] sm:$0xff]  ;;  %v863_v35 = vpack.c.bf16 %v609_v32, %v608_v31  ;;  %v1279_v31 = vld [vmem:[%s1706_s3 + $0x28] sm:$0xff] }
  0xe6   :  { %1210 = vmatpush.bf16.msra.mxu1 %v842_v45  ;;  %v124_v45 = vld [vmem:[#allocation2 + $0xd0] sm:$0xff]  ;;  %v984_v47 = vpop.f32.mrf.mxu3  ;;  %v854_v50 = vpack.c.bf16 %v591_v41, %v590_v39  ;;  %v624_v33 = vld [vmem:[#allocation5 + $0xe90] sm:$0xff] }
  0xe7   :  { %1223 = vmatpush.bf16.msra.mxu2 %v850_v46  ;;  %v123_v46 = vld [vmem:[#allocation2 + $0xc8] sm:$0xff]  ;;  %v622_v41 = vld [vmem:[#allocation5 + $0xe80] sm:$0xff] }
  0xe8   :  { %1236 = vmatpush.bf16.msra.mxu3 %v858_v55  ;;  %v154_v55 = vpack.c.bf16 %v124_v45, %v124_v45  ;;  %v126_v45 = vld [vmem:[#allocation2 + $0xe0] sm:$0xff]  ;;  %v127_v47 = vld [vmem:[#allocation2 + $0xe8] sm:$0xff] }
  0xe9   :  { %1198 = vmatpush.bf16.msra.mxu0 %v833_v56  ;;  %v153_v56 = vpack.c.bf16 %v123_v46, %v123_v46  ;;  %v870_v46 = vpack.c.bf16 %v623_v42, %v622_v41  ;;  %v1275_v41 = vld [vmem:[%s1706_s3 + $0x8] sm:$0xff] }
  0xea   :  { %1211 = vmatpush.bf16.msra.mxu1 %v841_v40  ;;  %v155_v40 = vpack.c.bf16 %v125_v52, %v125_v52 }
  0xeb   :  { %1224 = vmatpush.bf16.msra.mxu2 %v849_v59  ;;  %v868_v59 = vpack.c.bf16 %v619_v54, %v618_v53 }
  0xec   :  { %1237 = vmatpush.bf16.msra.mxu3 %v857_v3  ;;  %v614_v3 = vld [vmem:[#allocation5 + $0xe40] sm:$0xff] }
  0xed   :  { %1199 = vmatpush.bf16.msra.mxu0 %v832_v6  ;;  %v631_v6 = vld [vmem:[#allocation5 + $0xec8] sm:$0xff] }
  0xee   :  { %1212 = vmatpush.bf16.msra.mxu1 %v840_v9  ;;  %v866_v9 = vpack.c.bf16 %v615_v4, %v614_v3  ;;  %v874_v11 = vpack.c.bf16 %v631_v6, %v630_v5 }
  0xef   :  { %1225 = vmatpush.bf16.msra.mxu2 %v848_v10 }
  0xf0   :  { %1238 = vmatpush.bf16.msra.mxu3 %v856_v20 }
  0xf1   :  { %1200 = vmatpush.bf16.msra.mxu0 %v831_v21  ;;  %v610_v21 = vld [vmem:[#allocation5 + $0xe20] sm:$0xff] }
  0xf2   :  { %1213 = vmatpush.bf16.msra.mxu1 %v839_v25  ;;  %v627_v25 = vld [vmem:[#allocation5 + $0xea8] sm:$0xff]  ;;  %v864_v28 = vpack.c.bf16 %v611_v22, %v610_v21 }
  0xf3   :  { %1226 = vmatpush.bf16.msra.mxu2 %v847_v26  ;;  %v872_v30 = vpack.c.bf16 %v627_v25, %v626_v24  ;;  %v1283_v24 = vld [vmem:[%s1706_s3 + $0x48] sm:$0xff] }
  0xf4   :  { %1239 = vmatpush.bf16.msra.mxu3 %v855_v34  ;;  %v625_v34 = vld [vmem:[#allocation5 + $0xe98] sm:$0xff] }
  0xf5   :  { %1201 = vmatpush.bf16.msra.mxu0 %v830_v38  ;;  %v995_v7 = vpop.f32.mrf.mxu0  ;;  %v871_v36 = vpack.c.bf16 %v625_v34, %v624_v33  ;;  %v607_v38 = vld [vmem:[#allocation5 + $0xe08] sm:$0xff]  ;;  %v1276_v33 = vld [vmem:[%s1706_s3 + $0x10] sm:$0xff] }
  0xf6   :  { %1214 = vmatpush.bf16.msra.mxu1 %v838_v43  ;;  %v996_v8 = vadd.f32 %v995_v7, %v1625_v16  ;;  %v1008_v10 = vpop.f32.mrf.mxu1  ;;  %v1277_v34 = vld [vmem:[%s1706_s3 + $0x18] sm:$0xff] }
  0xf7   :  { %1227 = vmatpush.bf16.msra.mxu2 %v846_v44  ;;  %v862_v44 = vpack.c.bf16 %v607_v38, %v606_v37 }
  0xf8   :  { %1240 = vmatpush.bf16.msra.mxu3 %v854_v50  ;;  %1202 = vmatmul.bf16.vlgmr.msra.gmra.mxu0 %v152_v51  ;;  %v1009_v14 = vadd.f32 %v1008_v10, %v996_v8  ;;  %v1289_v10 = vld [vmem:[%s1706_s3 + $0x78] sm:$0xff] }
  0xf9   :  { %1246 = vmatpush.bf16.msrb.mxu0 %v869_v48  ;;  %1215 = vmatmul.bf16.vlgmr.msra.gmra.mxu1 %v153_v56  ;;  %v156_v48 = vpack.c.bf16 %v126_v45, %v126_v45 }
  0xfa   :  { %1259 = vmatpush.bf16.msrb.mxu1 %v877_v49  ;;  %1228 = vmatmul.bf16.vlgmr.msra.gmra.mxu2 %v154_v55  ;;  %v157_v49 = vpack.c.bf16 %v127_v47, %v127_v47  ;;  %v1324_v47 = vld [vmem:[%s1708_s5 + $0x38] sm:$0xff] }
  0xfb   :  { %1241 = vmatmul.bf16.vlgmr.msra.gmra.mxu3 %v155_v40 }
  0xfd   :  { %1247 = vmatpush.bf16.msrb.mxu0 %v868_v59  ;;  %v1021_v20 = vpop.f32.mrf.mxu2  ;;  %v997_v26 = vpop.f32.mrf.mxu0 }
  0xfe   :  { %1260 = vmatpush.bf16.msrb.mxu1 %v876_v60  ;;  %v1022_v23 = vadd.f32 %v1021_v20, %v1009_v14  ;;  %v1034_v16 = vpop.f32.mrf.mxu3  ;;  %v1010_v29 = vpop.f32.mrf.mxu1  ;;  %v1287_v14 = vld [vmem:[%s1706_s3 + $0x68] sm:$0xff]  ;;  %v1285_v20 = vld [vmem:[%s1706_s3 + $0x58] sm:$0xff]  ;;  %v1280_v26 = vld [vmem:[%s1706_s3 + $0x30] sm:$0xff] }
  0xff   :  { %v1295_v22 = vpack.c.bf16 %v1285_v20, %v1284_v15  ;;  %v1402_v20 = vld [vmem:[#allocation10] ss:$0 sm:$0xff] }
 0x100   :  { %v1035_v27 = vadd.f32 %v1034_v16, %v1022_v23  ;;  %v1282_v23 = vld [vmem:[%s1706_s3 + $0x40] sm:$0xff] }
 0x101   :  { %1248 = vmatpush.bf16.msrb.mxu0 %v867_v1  ;;  %v1294_v16 = vpack.c.bf16 %v1283_v24, %v1282_v23 }
 0x102   :  { %1261 = vmatpush.bf16.msrb.mxu1 %v875_v2 }
 0x105   :  { %1249 = vmatpush.bf16.msrb.mxu0 %v866_v9  ;;  %v1023_v39 = vpop.f32.mrf.mxu2  ;;  %v1288_v9 = vld [vmem:[%s1706_s3 + $0x70] sm:$0xff] }
 0x106   :  { %1262 = vmatpush.bf16.msrb.mxu1 %v874_v11  ;;  %v1036_v43 = vpop.f32.mrf.mxu3  ;;  %v1297_v11 = vpack.c.bf16 %v1289_v10, %v1288_v9  ;;  %v1274_v39 = vld [vmem:[%s1706_s3] sm:$0xff] }
 0x107   :  { %v1290_v42 = vpack.c.bf16 %v1275_v41, %v1274_v39  ;;  %v1317_v10 = vld [vmem:[%s1708_s5] sm:$0xff] }
 0x108   :  { %1302 = vmatpush.bf16.msrb.mxu2 %v1297_v11  ;;  %v1318_v11 = vld [vmem:[%s1708_s5 + $0x8] sm:$0xff] }
 0x109   :  { %1250 = vmatpush.bf16.msrb.mxu0 %v865_v18 }
 0x10a   :  { %1263 = vmatpush.bf16.msrb.mxu1 %v873_v19  ;;  %v1296_v19 = vpack.c.bf16 %v1287_v14, %v1286_v13  ;;  %v1401_v13 = vld [vmem:[#allocation8] ss:$0 sm:$0xff] }
 0x10c   :  { %1303 = vmatpush.bf16.msrb.mxu2 %v1296_v19 }
 0x10d   :  { %1251 = vmatpush.bf16.msrb.mxu0 %v864_v28 }
 0x10e   :  { %1264 = vmatpush.bf16.msrb.mxu1 %v872_v30  ;;  %v1278_v30 = vld [vmem:[%s1706_s3 + $0x20] sm:$0xff] }
 0x10f   :  { %v1292_v32 = vpack.c.bf16 %v1279_v31, %v1278_v30 }
 0x110   :  { %1304 = vmatpush.bf16.msrb.mxu2 %v1295_v22 }
 0x111   :  { %1252 = vmatpush.bf16.msrb.mxu0 %v863_v35  ;;  %v1291_v35 = vpack.c.bf16 %v1277_v34, %v1276_v33 }
 0x112   :  { %1265 = vmatpush.bf16.msrb.mxu1 %v871_v36 }
 0x114   :  { %1305 = vmatpush.bf16.msrb.mxu2 %v1294_v16 }
 0x115   :  { %1253 = vmatpush.bf16.msrb.mxu0 %v862_v44  ;;  %v1047_v50 = vpop.f32.mrf.mxu0 }
 0x116   :  { %1266 = vmatpush.bf16.msrb.mxu1 %v870_v46  ;;  %v1048_v51 = vadd.f32 %v1047_v50, %v1035_v27  ;;  %v1060_v52 = vpop.f32.mrf.mxu1  ;;  %v1281_v27 = vld [vmem:[%s1706_s3 + $0x38] sm:$0xff]  ;;  %v1323_v46 = vld [vmem:[%s1708_s5 + $0x30] sm:$0xff] }
 0x117   :  { %v1293_v29 = vpack.c.bf16 %v1281_v27, %v1280_v26  ;;  %v1328_v50 = vpack.c.bf16 %v1324_v47, %v1323_v46 }
 0x118   :  { %1254 = vmatmul.bf16.vlgmr.msrb.gmra.mxu0 %v156_v48  ;;  %v1061_v53 = vadd.f32 %v1060_v52, %v1048_v51  ;;  %v1321_v48 = vld [vmem:[%s1708_s5 + $0x20] sm:$0xff]  ;;  %v1322_v51 = vld [vmem:[%s1708_s5 + $0x28] sm:$0xff] }
 0x119   :  { %1267 = vmatmul.bf16.vlgmr.msrb.gmra.mxu1 %v157_v49  ;;  %1306 = vmatpush.bf16.msrb.mxu2 %v1293_v29 }
 0x11a   :  { %1341 = vmatpush.bf16.msrb.mxu3 %v1328_v50 }
 0x11d   :  { %v1073_v54 = vpop.f32.mrf.mxu2  ;;  %v1049_v57 = vpop.f32.mrf.mxu0  ;;  %1307 = vmatpush.bf16.msrb.mxu2 %v1292_v32 }
 0x11e   :  { %v1074_v55 = vadd.f32 %v1073_v54, %v1061_v53  ;;  %v1086_v56 = vpop.f32.mrf.mxu3  ;;  %v1062_v40 = vpop.f32.mrf.mxu1  ;;  %v1327_v54 = vpack.c.bf16 %v1322_v51, %v1321_v48  ;;  %v1320_v57 = vld [vmem:[%s1708_s5 + $0x18] sm:$0xff] }
 0x120   :  { %v1087_v58 = vadd.f32 %v1086_v56, %v1074_v55  ;;  %v1319_v56 = vld [vmem:[%s1708_s5 + $0x10] sm:$0xff]  ;;  %1342 = vmatpush.bf16.msrb.mxu3 %v1327_v54  ;;  %s1566_s5 = smov [#allocation11]  }
 0x121   :  { %1308 = vmatpush.bf16.msrb.mxu2 %v1291_v35  ;;  %v1326_v40 = vpack.c.bf16 %v1320_v57, %v1319_v56  ;;  %s1376_s18 = sshll.u32 %s1566_s5, 4  ;;  %s1377_s18 = int_to_ptr.vmem [resolvable:$true] %s1376_s18 }
 0x124   :  { %1343 = vmatpush.bf16.msrb.mxu3 %v1326_v40 }
 0x125   :  { %v1075_v59 = vpop.f32.mrf.mxu2  ;;  %1309 = vmatpush.bf16.msrb.mxu2 %v1290_v42 }
 0x126   :  { %v1088_v60 = vpop.f32.mrf.mxu3 }
 0x135   :  { %v1099_v61 = vpop.f32.mrf.mxu0 }
 0x136   :  { %v1100_v62 = vadd.f32 %v1099_v61, %v1087_v58  ;;  %v1112_v63 = vpop.f32.mrf.mxu1 }
 0x138   :  { %v1113_v0 = vadd.f32 %v1112_v63, %v1100_v62 }
 0x13d   :  { %v1125_v1 = vpop.f32.mrf.mxu2  ;;  %v1101_v3 = vpop.f32.mrf.mxu0 }
 0x13e   :  { %v1138_v2 = vpop.f32.mrf.mxu3  ;;  %v1114_v4 = vpop.f32.mrf.mxu1  ;;  %v1126_v37 = vadd.f32 %v1125_v1, %v1113_v0 }
 0x140   :  { %v1139_v43 = vadd.f32 %v1138_v2, %v1126_v37 }
 0x145   :  { %v1127_v5 = vpop.f32.mrf.mxu2 }
 0x146   :  { %v1140_v6 = vpop.f32.mrf.mxu3 }
 0x155   :  { %v1151_v7 = vpop.f32.mrf.mxu0 }
 0x156   :  { %v1164_v8 = vpop.f32.mrf.mxu1  ;;  %v1152_v44 = vadd.f32 %v1151_v7, %v1139_v43 }
 0x158   :  { %v1165_v55 = vadd.f32 %v1164_v8, %v1152_v44 }
 0x15d   :  { %v1177_v12 = vpop.f32.mrf.mxu2  ;;  %v1153_v18 = vpop.f32.mrf.mxu0 }
 0x15e   :  { %v1190_v17 = vpop.f32.mrf.mxu3  ;;  %v1166_v21 = vpop.f32.mrf.mxu1  ;;  %v1178_v58 = vadd.f32 %v1177_v12, %v1165_v55  ;;  %v1325_v12 = vpack.c.bf16 %v1318_v11, %v1317_v10 }
 0x160   :  { %v1191_v60 = vadd.f32 %v1190_v17, %v1178_v58  ;;  %1344 = vmatpush.bf16.msrb.mxu3 %v1325_v12 }
 0x165   :  { %v1179_v25 = vpop.f32.mrf.mxu2 }
 0x166   :  { %v1192_v28 = vpop.f32.mrf.mxu3 }
 0x175   :  { %v1203_v36 = vpop.f32.mrf.mxu0 }
 0x176   :  { %v1216_v38 = vpop.f32.mrf.mxu1  ;;  %v1204_v62 = vadd.f32 %v1203_v36, %v1191_v60 }
 0x178   :  { %v1217_v63 = vadd.f32 %v1216_v38, %v1204_v62 }
 0x17d   :  { %v1229_v45 = vpop.f32.mrf.mxu2  ;;  %v1205_v49 = vpop.f32.mrf.mxu0 }
 0x17e   :  { %v1242_v52 = vpop.f32.mrf.mxu3  ;;  %v1218_v53 = vpop.f32.mrf.mxu1  ;;  %v1230_v0 = vadd.f32 %v1229_v45, %v1217_v63 }
 0x180   :  { %v1243_v1 = vadd.f32 %v1242_v52, %v1230_v0 }
 0x185   :  { %v1231_v59 = vpop.f32.mrf.mxu2 }
 0x186   :  { %v1244_v61 = vpop.f32.mrf.mxu3 }
 0x195   :  { %v1255_v2 = vpop.f32.mrf.mxu0 }
 0x196   :  { %v1256_v3 = vadd.f32 %v1255_v2, %v1243_v1  ;;  %v1268_v4 = vpop.f32.mrf.mxu1 }
 0x198   :  { %v1269_v5 = vadd.f32 %v1268_v4, %v1256_v3 }
 0x19a   :  { %v1272_v6 = vmax.f32 %v1269_v5, 0.0 }
 0x19c   :  { %v1273_v7 = vpack.c.bf16 %v1272_v6, %v1272_v6 }
 0x19d   :  { %v1257_v8 = vpop.f32.mrf.mxu0 }
 0x19e   :  { %v1270_v9 = vpop.f32.mrf.mxu1  ;;  %1310 = vmatmul.bf16.vlgmr.msrb.gmra.mxu2 %v1273_v7 }
 0x221   :  { %v1311_v14 = vpop.f32.mrf.mxu2 }
 0x222   :  { %v1312_v15 = vadd.f32 %v1401_v13, %v1311_v14 }
 0x224   :  { %v1315_v17 = vmax.f32 %v1312_v15, 0.0 }
 0x226   :  { %v1316_v18 = vpack.c.bf16 %v1315_v17, %v1315_v17 }
 0x228   :  { %1390 = vmatmul.msk.bf16.vlgmr.msrb.gmra.mxu3 %vm1333_vm0, %v1316_v18 }
 0x229   :  { %v1313_v19 = vpop.f32.mrf.mxu2 }
 0x2ab   :  { %v1346_v21 = vpop.f32.mrf.mxu3 }
 0x2ac   :  { %v1347_v22 = vadd.f32 %v1402_v20, %v1346_v21 }
 0x2ae   :  { %v1391_v23 = vmul.f32 -1.442695, %v1347_v22 }
 0x2b0   :  { %1403 = vpow2.f32 %v1391_v23 }
 0x2b3   :  { %v1348_v24 = vpop.f32.mrf.mxu3 }
 0x2b6   :  { %v1404_v25 = vpop.eup %1403 }
 0x2b7   :  { %v1353_v16 = vadd.f32 1.0, %v1404_v25 }
 0x2b9   :  { %1405 = vrcp.f32 %v1353_v16  ;;  %v1365_v29 = vand.u32 2147483648, %v1353_v16  ;;  %v1363_v31 = vand.u32 2147483647, %v1353_v16  ;;  %vm1359_vm2 = vweird.f32 %v1353_v16 }
 0x2bb   :  { %v1366_v33 = vor.u32 1.1754944e-38, %v1365_v29  ;;  %vm1364_vm5 = vcmp.eq.f32.partialorder %v1363_v31, 8.507059e+37 }
 0x2bf   :  { %v1406_v26 = vpop.eup %1405 }
 0x2c0   :  { %v1355_v27 = vmul.f32 %v1406_v26, %v1353_v16  ;;  %vm1360_vm1 = vweird.f32 %v1406_v26 }
 0x2c1   :  { %vm1361_vm3 = vmor %vm1359_vm2, %vm1360_vm1 }
 0x2c2   :  { %v1356_v28 = vsub.f32 1.0, %v1355_v27 }
 0x2c4   :  { %v1357_v30 = vmul.f32 %v1406_v26, %v1356_v28 }
 0x2c6   :  { %v1358_v32 = vadd.f32 %v1406_v26, %v1357_v30 }
 0x2c8   :  { %v1362_v34 = vsel %vm1361_vm3, %v1406_v26, %v1358_v32 }
 0x2c9   :  { %v1367_v35 = vsel %vm1364_vm5, %v1366_v33, %v1362_v34 }
 0x2ca   :  { %1370 = vst.msk [vmem:[#allocation11] sm:$0xff] %vm1369_vm4, %v1367_v35 }
 0x2cb   :  { %1381 = dma.vmem_to_hbm [thread:$0]  %s1377_s18, 128, %s1379_s20, [#allocation4]  }
 0x2cc   :  { %1557 = dma.done.wait [#allocation4], 128  }
 0x2cd   :  { %1558 = vsyncadd [#allocation4], 4294967168 }
 0x2ce   :  { %1386 = vsyncpa [#allocation3], 1 }
 0x2cf   :  { %1387 = vsyncpa [#allocation6], 1 }
 0x2d0   :  { %1388 = vsyncpa [#allocation9], 1 }
 0x2d1   :  { %1389 = vsyncpa [#allocation4], 1 }

</bundles_post_ra>
